<compile_context>
chip_gen: v5e
topology: v5e:2x2
jax: 0.10.0
libtpu: 0.0.40
codegen_flags: <defaults>
</compile_context>

<pallas_src>
import functools

import jax
import jax.numpy as jnp
from jax.experimental import pallas as pl
from jax.experimental.pallas import tpu as pltpu


# ---------------------------------------------------------------------------
# Fused kernel: supports + gate GCN + update GCN + GRU blend, whole (sub)batch
# per grid step, everything resident in VMEM.
# ---------------------------------------------------------------------------
def _fused_cell_kernel(x_ref, state_ref, xfull_ref, arow_ref, xe_ref, he_ref,
                       hn_ref, ne_ref, sadj_ref, l1_ref, inc_ref,
                       wpg_ref, wpu_ref, wheh_ref, whn_ref,
                       h_ref, *,
                       hidden, link_len, embed_dim, bb):
    f32 = jnp.float32
    n = sadj_ref.shape[0]          # nodes
    e = l1_ref.shape[0]            # edges

    sadj = sadj_ref[...]           # (N, N)  adaptive adjacency (precomputed)
    ne = ne_ref[...]               # (N, D)
    l1 = l1_ref[...]               # (E, E)
    inc = inc_ref[...]             # (N, E)

    # ---------------- shared, hidden-state-independent pieces ---------------
    xs = [x_ref[b] for b in range(bb)]                       # (N, dim_in)
    sts = [state_ref[b] for b in range(bb)]                  # (N, H)
    # softmax(x_time)-weighted window block: one broadcast multiply per batch
    # (scale row prepared lane-contiguous in the wrapper).
    xfw = [xfull_ref[b] * arow_ref[b] for b in range(bb)]    # (N, T*dim_in)
    ones_col = jnp.ones((n, 1), f32)                         # adaptive-bias col

    # Hodge-Laplacian edge aggregation + hyper-edge features, batch in rows.
    ehh = jnp.concatenate(
        [jnp.concatenate(
            [jnp.dot(l1, xe_ref[b], preferred_element_type=f32), he_ref[b]],
            axis=-1) for b in range(bb)],
        axis=0)                                               # (Bb*E, Ce+Che)
    hn_all = jnp.concatenate([hn_ref[b] for b in range(bb)], axis=0)

    # Edge + hypergraph additive terms do NOT depend on the hidden part, so
    # they are computed once with the gate|update weight columns side by side.
    edge_msg = jnp.dot(ehh, wheh_ref[...], preferred_element_type=f32)  # (Bb*E, 3H)
    extra = jnp.dot(hn_all, whn_ref[...], preferred_element_type=f32)   # (Bb*N, 3H)
    extra = extra + jnp.concatenate(
        [jnp.dot(inc, edge_msg[b * e:(b + 1) * e, :],
                 preferred_element_type=f32) for b in range(bb)], axis=0)
    extra_g = extra[:, 0:2 * hidden]
    extra_u = extra[:, 2 * hidden:3 * hidden]

    # Node-embedding columns for the adaptive-weight mixing (hoisted, shared).
    ne_all = jnp.concatenate([ne] * bb, axis=0)               # (Bb*N, D)
    ne_cols = [ne_all[:, d:d + 1] for d in range(embed_dim)]

    def branch(h_parts, wp_ref, out_dim):
        """Node-adaptive part of the reconstructed HoHyGCNGCN.

        LHS columns: [hop_0 .. hop_{K-1} of [x||h] | alpha-weighted window | 1]
        -> ONE MXU matmul against the row-packed pool (rows in the same order,
        lane-dense (d, o) columns), then embedding mixing on the VPU.
        """
        rows = []
        for b in range(bb):
            xh = jnp.concatenate([xs[b], h_parts[b]], axis=-1)      # (N, cin)
            hops = [xh]
            for _ in range(1, link_len):
                hops.append(jnp.dot(sadj, hops[-1],
                                    preferred_element_type=f32))
            rows.append(jnp.concatenate(hops + [xfw[b], ones_col], axis=-1))
        lhs = jnp.concatenate(rows, axis=0)           # (Bb*N, K*cin + T*I + 1)
        pooled = jnp.dot(lhs, wp_ref[...],
                         preferred_element_type=f32)  # (Bb*N, D*O)

        out = ne_cols[0] * pooled[:, 0:out_dim]
        for d in range(1, embed_dim):
            out = out + ne_cols[d] * pooled[:, d * out_dim:(d + 1) * out_dim]
        return out

    # ---------------- GRU: gate -> candidate -> blend -----------------------
    zr = jax.nn.sigmoid(branch(sts, wpg_ref, 2 * hidden) + extra_g)  # (Bb*N,2H)
    z = zr[:, 0:hidden]                    # torch.split: first chunk is z
    r = zr[:, hidden:2 * hidden]           # second chunk is r
    zs = [z[b * n:(b + 1) * n, :] * sts[b] for b in range(bb)]
    hc = jnp.tanh(branch(zs, wpu_ref, hidden) + extra_u)
    st_all = jnp.concatenate(sts, axis=0)
    h_all = r * st_all + (1.0 - r) * hc                      # (Bb*N, H)
    # TODO(synk): lane-dense (B, H, N) store layout for production-size N.
    for b in range(bb):
        h_ref[b] = h_all[b * n:(b + 1) * n, :]


# ---------------------------------------------------------------------------
# BlockSpec helpers: per-batch arrays get a (bb, ...) block over grid axis 0;
# shared weights / graph operators get a full-array block.
# ---------------------------------------------------------------------------
def _batch_spec(shape, bb):
    rest = tuple(int(s) for s in shape[1:])
    zeros = (0,) * len(rest)
    return pl.BlockSpec((bb,) + rest, lambda g: (g,) + zeros)


def _shared_spec(shape):
    full = tuple(int(s) for s in shape)
    zeros = (0,) * len(full)
    return pl.BlockSpec(full, lambda g: zeros)


# ---------------------------------------------------------------------------
# Host-side weight packing (layout plumbing only, fused by XLA).
# ---------------------------------------------------------------------------
def _pack_pool(branch, link_len, window_len, dim_in, cin, out_dim, embed_dim):
    wp = branch['weights_pool']      # (D, K, Cin, O)
    ww = branch['weights_window']    # (D, T, I, O)
    bp = branch['bias_pool']         # (D, O)
    wp2 = jnp.transpose(wp, (1, 2, 0, 3)).reshape(link_len * cin,
                                                  embed_dim * out_dim)
    ww2 = jnp.transpose(ww, (1, 2, 0, 3)).reshape(window_len * dim_in,
                                                  embed_dim * out_dim)
    bp2 = bp.reshape(1, embed_dim * out_dim)
    # rows: [K blocks of cin | T blocks of dim_in | bias]; cols: d*O + o.
    return jnp.concatenate([wp2, ww2, bp2], axis=0)


def _pack_hyper(params):
    g, u = params['gate'], params['update']
    wheh = jnp.concatenate(
        [jnp.concatenate([g['w_edge'], g['w_hyper_edge']], axis=0),
         jnp.concatenate([u['w_edge'], u['w_hyper_edge']], axis=0)],
        axis=1)                                   # (Ce+Che, 2H + H)
    whn = jnp.concatenate([g['w_hyper_node'], u['w_hyper_node']], axis=1)
    return wheh, whn


# ---------------------------------------------------------------------------
# Parameters (deterministic synthetic init) + cell forward.
# ---------------------------------------------------------------------------
def init_params(key, dim_in, dim_e_in, dim_out, window_len, link_len,
                embed_dim, dim_he, dim_hn):
    cin = dim_in + dim_out

    def branch(k, o):
        ks = jax.random.split(k, 6)
        s = 0.1
        return dict(
            weights_pool=s * jax.random.normal(
                ks[0], (embed_dim, link_len, cin, o), jnp.float32),
            bias_pool=s * jax.random.normal(ks[1], (embed_dim, o), jnp.float32),
            weights_window=s * jax.random.normal(
                ks[2], (embed_dim, window_len, dim_in, o), jnp.float32),
            w_edge=s * jax.random.normal(ks[3], (dim_e_in, o), jnp.float32),
            w_hyper_edge=s * jax.random.normal(ks[4], (dim_he, o), jnp.float32),
            w_hyper_node=s * jax.random.normal(ks[5], (dim_hn, o), jnp.float32),
        )

    kg, ku = jax.random.split(key)
    return dict(gate=branch(kg, 2 * dim_out), update=branch(ku, dim_out))


def hohy_gcrnn_cell(params, x, state, x_full, node_embeddings, x_time, x_e,
                    hodge_laplacian, incidence_matrix, hyper_edge_data,
                    hyper_node_data, *, link_len, batch_blocks=1):
    B, N, dim_in = x.shape
    hidden = state.shape[-1]
    window_len = x_full.shape[1]
    embed_dim = node_embeddings.shape[-1]
    cin = dim_in + hidden
    assert B % batch_blocks == 0
    bb = B // batch_blocks        # batch rows handled per grid step

    # Batch-independent adaptive adjacency hoisted out of the kernel.
    gram = node_embeddings @ node_embeddings.T
    s_adj = jax.nn.softmax(jnp.maximum(gram, 0.0), axis=1)        # (N, N)

    # Temporal softmax weights, pre-broadcast into one lane-contiguous scale
    # row per batch (tiny; the scaling of the window data stays in-kernel).
    alpha = jax.nn.softmax(x_time, axis=-1)                       # (B, T)
    alpha_row = jnp.repeat(alpha, dim_in, axis=-1)[:, None, :]    # (B, 1, T*I)

    # Window arranged (B, N, T*dim_in): one lane-contiguous block per batch.
    xfull_r = jnp.transpose(x_full, (0, 2, 1, 3)).reshape(
        B, N, window_len * dim_in)

    wpg = _pack_pool(params['gate'], link_len, window_len, dim_in, cin,
                     2 * hidden, embed_dim)
    wpu = _pack_pool(params['update'], link_len, window_len, dim_in, cin,
                     hidden, embed_dim)
    wheh, whn = _pack_hyper(params)

    batch_args = (x, state, xfull_r, alpha_row, x_e, hyper_edge_data,
                  hyper_node_data)
    shared_args = (node_embeddings, s_adj, hodge_laplacian, incidence_matrix,
                   wpg, wpu, wheh, whn)
    in_specs = ([_batch_spec(a.shape, bb) for a in batch_args] +
                [_shared_spec(a.shape) for a in shared_args])

    kernel = functools.partial(_fused_cell_kernel, hidden=hidden,
                               link_len=link_len, embed_dim=embed_dim, bb=bb)

    return pl.pallas_call(
        kernel,
        grid=(batch_blocks,),       # 1 -> single step (v5e/v6e); 2 -> v7x TCs
        in_specs=in_specs,
        out_specs=_batch_spec((B, N, hidden), bb),
        out_shape=jax.ShapeDtypeStruct((B, N, hidden), jnp.float32),
        compiler_params=pltpu.CompilerParams(
            dimension_semantics=("parallel",)),
    )(*batch_args, *shared_args)


if __name__ == "__main__":
    B, N, E = 2, 16, 24
    dim_in, dim_e_in, dim_out = 2, 2, 8
    window_len, link_len, embed_dim = 4, 3, 8
    dim_he, dim_hn = 3, 3

    key = jax.random.PRNGKey(0)
    keys = jax.random.split(key, 12)
    params = init_params(keys[0], dim_in, dim_e_in, dim_out, window_len,
                         link_len, embed_dim, dim_he, dim_hn)

    x = jax.random.normal(keys[1], (B, N, dim_in), jnp.float32)
    state = jax.random.normal(keys[2], (B, N, dim_out), jnp.float32)
    x_full = jax.random.normal(keys[3], (B, window_len, N, dim_in), jnp.float32)
    node_embeddings = jax.random.normal(keys[4], (N, embed_dim), jnp.float32)
    x_time = jax.random.normal(keys[5], (B, window_len), jnp.float32)
    x_e = jax.random.normal(keys[6], (B, E, dim_e_in), jnp.float32)
    hodge_laplacian = jax.random.normal(keys[7], (E, E), jnp.float32)
    incidence_matrix = jax.random.normal(keys[8], (N, E), jnp.float32)
    hyper_edge_data = jax.random.normal(keys[9], (B, E, dim_he), jnp.float32)
    hyper_node_data = jax.random.normal(keys[10], (B, N, dim_hn), jnp.float32)

    fwd = jax.jit(functools.partial(hohy_gcrnn_cell, link_len=link_len))
    h = fwd(params, x, state, x_full, node_embeddings, x_time, x_e,
            hodge_laplacian, incidence_matrix, hyper_edge_data,
            hyper_node_data)
    jax.block_until_ready(h)
    assert h.shape == (B, N, dim_out) and h.dtype == jnp.float32
    assert bool(jnp.isfinite(h).all())
    print("KERNEL_OK")
</pallas_src>

<mosaic_0001>
module attributes {stable_mosaic.version = 11 : i64} {
  func.func @_fused_cell_kernel(%arg0: i32, %arg1: memref<2x16x2xf32, #tpu.memory_space<vmem>>, %arg2: memref<2x16x8xf32, #tpu.memory_space<vmem>>, %arg3: memref<2x16x8xf32, #tpu.memory_space<vmem>>, %arg4: memref<2x1x8xf32, #tpu.memory_space<vmem>>, %arg5: memref<2x24x2xf32, #tpu.memory_space<vmem>>, %arg6: memref<2x24x3xf32, #tpu.memory_space<vmem>>, %arg7: memref<2x16x3xf32, #tpu.memory_space<vmem>>, %arg8: memref<16x8xf32, #tpu.memory_space<vmem>>, %arg9: memref<16x16xf32, #tpu.memory_space<vmem>>, %arg10: memref<24x24xf32, #tpu.memory_space<vmem>>, %arg11: memref<16x24xf32, #tpu.memory_space<vmem>>, %arg12: memref<39x128xf32, #tpu.memory_space<vmem>>, %arg13: memref<39x64xf32, #tpu.memory_space<vmem>>, %arg14: memref<5x24xf32, #tpu.memory_space<vmem>>, %arg15: memref<3x24xf32, #tpu.memory_space<vmem>>, %arg16: memref<2x16x8xf32, #tpu.memory_space<vmem>>) attributes {dimension_semantics = [#tpu.dimension_semantics<parallel>], iteration_bounds = array<i64: 1>, scalar_prefetch = 0 : i64, scratch_operands = 0 : i64, tpu.core_type = #tpu.core_type<tc>, window_params = [{transform_indices = @transform_0, window_bounds = array<i64: 2, 16, 2>}, {transform_indices = @transform_1, window_bounds = array<i64: 2, 16, 8>}, {transform_indices = @transform_2, window_bounds = array<i64: 2, 16, 8>}, {transform_indices = @transform_3, window_bounds = array<i64: 2, 1, 8>}, {transform_indices = @transform_4, window_bounds = array<i64: 2, 24, 2>}, {transform_indices = @transform_5, window_bounds = array<i64: 2, 24, 3>}, {transform_indices = @transform_6, window_bounds = array<i64: 2, 16, 3>}, {pipeline_mode = #tpu.pipeline_mode<synchronous>, transform_indices = @transform_7, window_bounds = array<i64: 16, 8>}, {pipeline_mode = #tpu.pipeline_mode<synchronous>, transform_indices = @transform_8, window_bounds = array<i64: 16, 16>}, {pipeline_mode = #tpu.pipeline_mode<synchronous>, transform_indices = @transform_9, window_bounds = array<i64: 24, 24>}, {pipeline_mode = #tpu.pipeline_mode<synchronous>, transform_indices = @transform_10, window_bounds = array<i64: 16, 24>}, {pipeline_mode = #tpu.pipeline_mode<synchronous>, transform_indices = @transform_11, window_bounds = array<i64: 39, 128>}, {pipeline_mode = #tpu.pipeline_mode<synchronous>, transform_indices = @transform_12, window_bounds = array<i64: 39, 64>}, {pipeline_mode = #tpu.pipeline_mode<synchronous>, transform_indices = @transform_13, window_bounds = array<i64: 5, 24>}, {pipeline_mode = #tpu.pipeline_mode<synchronous>, transform_indices = @transform_14, window_bounds = array<i64: 3, 24>}, {transform_indices = @transform_15, window_bounds = array<i64: 2, 16, 8>}]} {
    %c0 = arith.constant 0 : index
    %c0_0 = arith.constant 0 : index
    %0 = vector.load %arg9[%c0, %c0_0] : memref<16x16xf32, #tpu.memory_space<vmem>>, vector<16x16xf32>
    %c0_1 = arith.constant 0 : index
    %c0_2 = arith.constant 0 : index
    %1 = vector.load %arg8[%c0_1, %c0_2] : memref<16x8xf32, #tpu.memory_space<vmem>>, vector<16x8xf32>
    %c0_3 = arith.constant 0 : index
    %c0_4 = arith.constant 0 : index
    %2 = vector.load %arg10[%c0_3, %c0_4] : memref<24x24xf32, #tpu.memory_space<vmem>>, vector<24x24xf32>
    %c0_5 = arith.constant 0 : index
    %c0_6 = arith.constant 0 : index
    %3 = vector.load %arg11[%c0_5, %c0_6] : memref<16x24xf32, #tpu.memory_space<vmem>>, vector<16x24xf32>
    %c0_7 = arith.constant 0 : index
    %c0_8 = arith.constant 0 : index
    %c0_9 = arith.constant 0 : index
    %4 = vector.load %arg1[%c0_7, %c0_8, %c0_9] : memref<2x16x2xf32, #tpu.memory_space<vmem>>, vector<1x16x2xf32>
    %5 = vector.shape_cast %4 : vector<1x16x2xf32> to vector<16x2xf32>
    %c1 = arith.constant 1 : index
    %c0_10 = arith.constant 0 : index
    %c0_11 = arith.constant 0 : index
    %6 = vector.load %arg1[%c1, %c0_10, %c0_11] : memref<2x16x2xf32, #tpu.memory_space<vmem>>, vector<1x16x2xf32>
    %7 = vector.shape_cast %6 : vector<1x16x2xf32> to vector<16x2xf32>
    %c0_12 = arith.constant 0 : index
    %c0_13 = arith.constant 0 : index
    %c0_14 = arith.constant 0 : index
    %8 = vector.load %arg2[%c0_12, %c0_13, %c0_14] : memref<2x16x8xf32, #tpu.memory_space<vmem>>, vector<1x16x8xf32>
    %9 = vector.shape_cast %8 : vector<1x16x8xf32> to vector<16x8xf32>
    %c1_15 = arith.constant 1 : index
    %c0_16 = arith.constant 0 : index
    %c0_17 = arith.constant 0 : index
    %10 = vector.load %arg2[%c1_15, %c0_16, %c0_17] : memref<2x16x8xf32, #tpu.memory_space<vmem>>, vector<1x16x8xf32>
    %11 = vector.shape_cast %10 : vector<1x16x8xf32> to vector<16x8xf32>
    %c0_18 = arith.constant 0 : index
    %c0_19 = arith.constant 0 : index
    %c0_20 = arith.constant 0 : index
    %12 = vector.load %arg3[%c0_18, %c0_19, %c0_20] : memref<2x16x8xf32, #tpu.memory_space<vmem>>, vector<1x16x8xf32>
    %13 = vector.shape_cast %12 : vector<1x16x8xf32> to vector<16x8xf32>
    %c0_21 = arith.constant 0 : index
    %c0_22 = arith.constant 0 : index
    %c0_23 = arith.constant 0 : index
    %14 = vector.load %arg4[%c0_21, %c0_22, %c0_23] : memref<2x1x8xf32, #tpu.memory_space<vmem>>, vector<1x1x8xf32>
    %15 = vector.shape_cast %14 : vector<1x1x8xf32> to vector<1x8xf32>
    %16 = vector.broadcast %15 : vector<1x8xf32> to vector<16x8xf32>
    %17 = arith.mulf %13, %16 : vector<16x8xf32>
    %c1_24 = arith.constant 1 : index
    %c0_25 = arith.constant 0 : index
    %c0_26 = arith.constant 0 : index
    %18 = vector.load %arg3[%c1_24, %c0_25, %c0_26] : memref<2x16x8xf32, #tpu.memory_space<vmem>>, vector<1x16x8xf32>
    %19 = vector.shape_cast %18 : vector<1x16x8xf32> to vector<16x8xf32>
    %c1_27 = arith.constant 1 : index
    %c0_28 = arith.constant 0 : index
    %c0_29 = arith.constant 0 : index
    %20 = vector.load %arg4[%c1_27, %c0_28, %c0_29] : memref<2x1x8xf32, #tpu.memory_space<vmem>>, vector<1x1x8xf32>
    %21 = vector.shape_cast %20 : vector<1x1x8xf32> to vector<1x8xf32>
    %22 = vector.broadcast %21 : vector<1x8xf32> to vector<16x8xf32>
    %23 = arith.mulf %19, %22 : vector<16x8xf32>
    %cst = arith.constant 1.000000e+00 : f32
    %24 = vector.broadcast %cst : f32 to vector<16x1xf32>
    %c0_30 = arith.constant 0 : index
    %c0_31 = arith.constant 0 : index
    %c0_32 = arith.constant 0 : index
    %25 = vector.load %arg5[%c0_30, %c0_31, %c0_32] : memref<2x24x2xf32, #tpu.memory_space<vmem>>, vector<1x24x2xf32>
    %26 = vector.shape_cast %25 : vector<1x24x2xf32> to vector<24x2xf32>
    %cst_33 = arith.constant dense<0.000000e+00> : vector<24x2xf32>
    %27 = tpu.matmul %2, %26, %cst_33 {dimension_numbers = #tpu.dot_dimension_numbers<[1], [0], [0], [1], [0, 0, 1, 1], [], []>} : vector<24x24xf32>, vector<24x2xf32>, vector<24x2xf32> -> vector<24x2xf32>
    %c0_34 = arith.constant 0 : index
    %c0_35 = arith.constant 0 : index
    %c0_36 = arith.constant 0 : index
    %28 = vector.load %arg6[%c0_34, %c0_35, %c0_36] : memref<2x24x3xf32, #tpu.memory_space<vmem>>, vector<1x24x3xf32>
    %29 = vector.shape_cast %28 : vector<1x24x3xf32> to vector<24x3xf32>
    %30 = tpu.concatenate %27, %29 in 1 : vector<24x2xf32>, vector<24x3xf32> -> vector<24x5xf32>
    %c1_37 = arith.constant 1 : index
    %c0_38 = arith.constant 0 : index
    %c0_39 = arith.constant 0 : index
    %31 = vector.load %arg5[%c1_37, %c0_38, %c0_39] : memref<2x24x2xf32, #tpu.memory_space<vmem>>, vector<1x24x2xf32>
    %32 = vector.shape_cast %31 : vector<1x24x2xf32> to vector<24x2xf32>
    %cst_40 = arith.constant dense<0.000000e+00> : vector<24x2xf32>
    %33 = tpu.matmul %2, %32, %cst_40 {dimension_numbers = #tpu.dot_dimension_numbers<[1], [0], [0], [1], [0, 0, 1, 1], [], []>} : vector<24x24xf32>, vector<24x2xf32>, vector<24x2xf32> -> vector<24x2xf32>
    %c1_41 = arith.constant 1 : index
    %c0_42 = arith.constant 0 : index
    %c0_43 = arith.constant 0 : index
    %34 = vector.load %arg6[%c1_41, %c0_42, %c0_43] : memref<2x24x3xf32, #tpu.memory_space<vmem>>, vector<1x24x3xf32>
    %35 = vector.shape_cast %34 : vector<1x24x3xf32> to vector<24x3xf32>
    %36 = tpu.concatenate %33, %35 in 1 : vector<24x2xf32>, vector<24x3xf32> -> vector<24x5xf32>
    %37 = tpu.concatenate %30, %36 in 0 : vector<24x5xf32>, vector<24x5xf32> -> vector<48x5xf32>
    %c0_44 = arith.constant 0 : index
    %c0_45 = arith.constant 0 : index
    %c0_46 = arith.constant 0 : index
    %38 = vector.load %arg7[%c0_44, %c0_45, %c0_46] : memref<2x16x3xf32, #tpu.memory_space<vmem>>, vector<1x16x3xf32>
    %39 = vector.shape_cast %38 : vector<1x16x3xf32> to vector<16x3xf32>
    %c1_47 = arith.constant 1 : index
    %c0_48 = arith.constant 0 : index
    %c0_49 = arith.constant 0 : index
    %40 = vector.load %arg7[%c1_47, %c0_48, %c0_49] : memref<2x16x3xf32, #tpu.memory_space<vmem>>, vector<1x16x3xf32>
    %41 = vector.shape_cast %40 : vector<1x16x3xf32> to vector<16x3xf32>
    %42 = tpu.concatenate %39, %41 in 0 : vector<16x3xf32>, vector<16x3xf32> -> vector<32x3xf32>
    %c0_50 = arith.constant 0 : index
    %c0_51 = arith.constant 0 : index
    %43 = vector.load %arg14[%c0_50, %c0_51] : memref<5x24xf32, #tpu.memory_space<vmem>>, vector<5x24xf32>
    %cst_52 = arith.constant dense<0.000000e+00> : vector<48x24xf32>
    %44 = tpu.matmul %37, %43, %cst_52 {dimension_numbers = #tpu.dot_dimension_numbers<[1], [0], [0], [1], [0, 0, 1, 1], [], []>} : vector<48x5xf32>, vector<5x24xf32>, vector<48x24xf32> -> vector<48x24xf32>
    %c0_53 = arith.constant 0 : index
    %c0_54 = arith.constant 0 : index
    %45 = vector.load %arg15[%c0_53, %c0_54] : memref<3x24xf32, #tpu.memory_space<vmem>>, vector<3x24xf32>
    %cst_55 = arith.constant dense<0.000000e+00> : vector<32x24xf32>
    %46 = tpu.matmul %42, %45, %cst_55 {dimension_numbers = #tpu.dot_dimension_numbers<[1], [0], [0], [1], [0, 0, 1, 1], [], []>} : vector<32x3xf32>, vector<3x24xf32>, vector<32x24xf32> -> vector<32x24xf32>
    %47 = vector.extract_strided_slice %44 {offsets = [0, 0], sizes = [24, 24], strides = [1, 1]} : vector<48x24xf32> to vector<24x24xf32>
    %cst_56 = arith.constant dense<0.000000e+00> : vector<16x24xf32>
    %48 = tpu.matmul %3, %47, %cst_56 {dimension_numbers = #tpu.dot_dimension_numbers<[1], [0], [0], [1], [0, 0, 1, 1], [], []>} : vector<16x24xf32>, vector<24x24xf32>, vector<16x24xf32> -> vector<16x24xf32>
    %49 = vector.extract_strided_slice %44 {offsets = [24, 0], sizes = [24, 24], strides = [1, 1]} : vector<48x24xf32> to vector<24x24xf32>
    %cst_57 = arith.constant dense<0.000000e+00> : vector<16x24xf32>
    %50 = tpu.matmul %3, %49, %cst_57 {dimension_numbers = #tpu.dot_dimension_numbers<[1], [0], [0], [1], [0, 0, 1, 1], [], []>} : vector<16x24xf32>, vector<24x24xf32>, vector<16x24xf32> -> vector<16x24xf32>
    %51 = tpu.concatenate %48, %50 in 0 : vector<16x24xf32>, vector<16x24xf32> -> vector<32x24xf32>
    %52 = arith.addf %46, %51 : vector<32x24xf32>
    %53 = vector.extract_strided_slice %52 {offsets = [0, 0], sizes = [32, 16], strides = [1, 1]} : vector<32x24xf32> to vector<32x16xf32>
    %54 = vector.extract_strided_slice %52 {offsets = [0, 16], sizes = [32, 8], strides = [1, 1]} : vector<32x24xf32> to vector<32x8xf32>
    %55 = tpu.concatenate %1, %1 in 0 : vector<16x8xf32>, vector<16x8xf32> -> vector<32x8xf32>
    %56 = vector.extract_strided_slice %55 {offsets = [0, 0], sizes = [32, 1], strides = [1, 1]} : vector<32x8xf32> to vector<32x1xf32>
    %57 = vector.extract_strided_slice %55 {offsets = [0, 1], sizes = [32, 1], strides = [1, 1]} : vector<32x8xf32> to vector<32x1xf32>
    %58 = vector.extract_strided_slice %55 {offsets = [0, 2], sizes = [32, 1], strides = [1, 1]} : vector<32x8xf32> to vector<32x1xf32>
    %59 = vector.extract_strided_slice %55 {offsets = [0, 3], sizes = [32, 1], strides = [1, 1]} : vector<32x8xf32> to vector<32x1xf32>
    %60 = vector.extract_strided_slice %55 {offsets = [0, 4], sizes = [32, 1], strides = [1, 1]} : vector<32x8xf32> to vector<32x1xf32>
    %61 = vector.extract_strided_slice %55 {offsets = [0, 5], sizes = [32, 1], strides = [1, 1]} : vector<32x8xf32> to vector<32x1xf32>
    %62 = vector.extract_strided_slice %55 {offsets = [0, 6], sizes = [32, 1], strides = [1, 1]} : vector<32x8xf32> to vector<32x1xf32>
    %63 = vector.extract_strided_slice %55 {offsets = [0, 7], sizes = [32, 1], strides = [1, 1]} : vector<32x8xf32> to vector<32x1xf32>
    %64 = tpu.concatenate %5, %9 in 1 : vector<16x2xf32>, vector<16x8xf32> -> vector<16x10xf32>
    %cst_58 = arith.constant dense<0.000000e+00> : vector<16x10xf32>
    %65 = tpu.matmul %0, %64, %cst_58 {dimension_numbers = #tpu.dot_dimension_numbers<[1], [0], [0], [1], [0, 0, 1, 1], [], []>} : vector<16x16xf32>, vector<16x10xf32>, vector<16x10xf32> -> vector<16x10xf32>
    %cst_59 = arith.constant dense<0.000000e+00> : vector<16x10xf32>
    %66 = tpu.matmul %0, %65, %cst_59 {dimension_numbers = #tpu.dot_dimension_numbers<[1], [0], [0], [1], [0, 0, 1, 1], [], []>} : vector<16x16xf32>, vector<16x10xf32>, vector<16x10xf32> -> vector<16x10xf32>
    %67 = tpu.concatenate %64, %65, %66, %17, %24 in 1 : vector<16x10xf32>, vector<16x10xf32>, vector<16x10xf32>, vector<16x8xf32>, vector<16x1xf32> -> vector<16x39xf32>
    %68 = tpu.concatenate %7, %11 in 1 : vector<16x2xf32>, vector<16x8xf32> -> vector<16x10xf32>
    %cst_60 = arith.constant dense<0.000000e+00> : vector<16x10xf32>
    %69 = tpu.matmul %0, %68, %cst_60 {dimension_numbers = #tpu.dot_dimension_numbers<[1], [0], [0], [1], [0, 0, 1, 1], [], []>} : vector<16x16xf32>, vector<16x10xf32>, vector<16x10xf32> -> vector<16x10xf32>
    %cst_61 = arith.constant dense<0.000000e+00> : vector<16x10xf32>
    %70 = tpu.matmul %0, %69, %cst_61 {dimension_numbers = #tpu.dot_dimension_numbers<[1], [0], [0], [1], [0, 0, 1, 1], [], []>} : vector<16x16xf32>, vector<16x10xf32>, vector<16x10xf32> -> vector<16x10xf32>
    %71 = tpu.concatenate %68, %69, %70, %23, %24 in 1 : vector<16x10xf32>, vector<16x10xf32>, vector<16x10xf32>, vector<16x8xf32>, vector<16x1xf32> -> vector<16x39xf32>
    %72 = tpu.concatenate %67, %71 in 0 : vector<16x39xf32>, vector<16x39xf32> -> vector<32x39xf32>
    %c0_62 = arith.constant 0 : index
    %c0_63 = arith.constant 0 : index
    %73 = vector.load %arg12[%c0_62, %c0_63] : memref<39x128xf32, #tpu.memory_space<vmem>>, vector<39x128xf32>
    %cst_64 = arith.constant dense<0.000000e+00> : vector<32x128xf32>
    %74 = tpu.matmul %72, %73, %cst_64 {dimension_numbers = #tpu.dot_dimension_numbers<[1], [0], [0], [1], [0, 0, 1, 1], [], []>} : vector<32x39xf32>, vector<39x128xf32>, vector<32x128xf32> -> vector<32x128xf32>
    %75 = vector.extract_strided_slice %74 {offsets = [0, 0], sizes = [32, 16], strides = [1, 1]} : vector<32x128xf32> to vector<32x16xf32>
    %76 = vector.broadcast %56 : vector<32x1xf32> to vector<32x16xf32>
    %77 = arith.mulf %76, %75 : vector<32x16xf32>
    %78 = vector.extract_strided_slice %74 {offsets = [0, 16], sizes = [32, 16], strides = [1, 1]} : vector<32x128xf32> to vector<32x16xf32>
    %79 = vector.broadcast %57 : vector<32x1xf32> to vector<32x16xf32>
    %80 = arith.mulf %79, %78 : vector<32x16xf32>
    %81 = arith.addf %77, %80 : vector<32x16xf32>
    %82 = vector.extract_strided_slice %74 {offsets = [0, 32], sizes = [32, 16], strides = [1, 1]} : vector<32x128xf32> to vector<32x16xf32>
    %83 = vector.broadcast %58 : vector<32x1xf32> to vector<32x16xf32>
    %84 = arith.mulf %83, %82 : vector<32x16xf32>
    %85 = arith.addf %81, %84 : vector<32x16xf32>
    %86 = vector.extract_strided_slice %74 {offsets = [0, 48], sizes = [32, 16], strides = [1, 1]} : vector<32x128xf32> to vector<32x16xf32>
    %87 = vector.broadcast %59 : vector<32x1xf32> to vector<32x16xf32>
    %88 = arith.mulf %87, %86 : vector<32x16xf32>
    %89 = arith.addf %85, %88 : vector<32x16xf32>
    %90 = vector.extract_strided_slice %74 {offsets = [0, 64], sizes = [32, 16], strides = [1, 1]} : vector<32x128xf32> to vector<32x16xf32>
    %91 = vector.broadcast %60 : vector<32x1xf32> to vector<32x16xf32>
    %92 = arith.mulf %91, %90 : vector<32x16xf32>
    %93 = arith.addf %89, %92 : vector<32x16xf32>
    %94 = vector.extract_strided_slice %74 {offsets = [0, 80], sizes = [32, 16], strides = [1, 1]} : vector<32x128xf32> to vector<32x16xf32>
    %95 = vector.broadcast %61 : vector<32x1xf32> to vector<32x16xf32>
    %96 = arith.mulf %95, %94 : vector<32x16xf32>
    %97 = arith.addf %93, %96 : vector<32x16xf32>
    %98 = vector.extract_strided_slice %74 {offsets = [0, 96], sizes = [32, 16], strides = [1, 1]} : vector<32x128xf32> to vector<32x16xf32>
    %99 = vector.broadcast %62 : vector<32x1xf32> to vector<32x16xf32>
    %100 = arith.mulf %99, %98 : vector<32x16xf32>
    %101 = arith.addf %97, %100 : vector<32x16xf32>
    %102 = vector.extract_strided_slice %74 {offsets = [0, 112], sizes = [32, 16], strides = [1, 1]} : vector<32x128xf32> to vector<32x16xf32>
    %103 = vector.broadcast %63 : vector<32x1xf32> to vector<32x16xf32>
    %104 = arith.mulf %103, %102 : vector<32x16xf32>
    %105 = arith.addf %101, %104 : vector<32x16xf32>
    %106 = arith.addf %105, %53 : vector<32x16xf32>
    %107 = arith.negf %106 : vector<32x16xf32>
    %108 = math.exp %107 : vector<32x16xf32>
    %cst_65 = arith.constant 1.000000e+00 : f32
    %109 = vector.broadcast %cst_65 : f32 to vector<32x16xf32>
    %110 = arith.addf %109, %108 : vector<32x16xf32>
    %111 = arith.divf %109, %110 : vector<32x16xf32>
    %112 = vector.extract_strided_slice %111 {offsets = [0, 0], sizes = [32, 8], strides = [1, 1]} : vector<32x16xf32> to vector<32x8xf32>
    %113 = vector.extract_strided_slice %111 {offsets = [0, 8], sizes = [32, 8], strides = [1, 1]} : vector<32x16xf32> to vector<32x8xf32>
    %114 = vector.extract_strided_slice %112 {offsets = [0, 0], sizes = [16, 8], strides = [1, 1]} : vector<32x8xf32> to vector<16x8xf32>
    %115 = arith.mulf %114, %9 : vector<16x8xf32>
    %116 = vector.extract_strided_slice %112 {offsets = [16, 0], sizes = [16, 8], strides = [1, 1]} : vector<32x8xf32> to vector<16x8xf32>
    %117 = arith.mulf %116, %11 : vector<16x8xf32>
    %118 = tpu.concatenate %5, %115 in 1 : vector<16x2xf32>, vector<16x8xf32> -> vector<16x10xf32>
    %cst_66 = arith.constant dense<0.000000e+00> : vector<16x10xf32>
    %119 = tpu.matmul %0, %118, %cst_66 {dimension_numbers = #tpu.dot_dimension_numbers<[1], [0], [0], [1], [0, 0, 1, 1], [], []>} : vector<16x16xf32>, vector<16x10xf32>, vector<16x10xf32> -> vector<16x10xf32>
    %cst_67 = arith.constant dense<0.000000e+00> : vector<16x10xf32>
    %120 = tpu.matmul %0, %119, %cst_67 {dimension_numbers = #tpu.dot_dimension_numbers<[1], [0], [0], [1], [0, 0, 1, 1], [], []>} : vector<16x16xf32>, vector<16x10xf32>, vector<16x10xf32> -> vector<16x10xf32>
    %121 = tpu.concatenate %118, %119, %120, %17, %24 in 1 : vector<16x10xf32>, vector<16x10xf32>, vector<16x10xf32>, vector<16x8xf32>, vector<16x1xf32> -> vector<16x39xf32>
    %122 = tpu.concatenate %7, %117 in 1 : vector<16x2xf32>, vector<16x8xf32> -> vector<16x10xf32>
    %cst_68 = arith.constant dense<0.000000e+00> : vector<16x10xf32>
    %123 = tpu.matmul %0, %122, %cst_68 {dimension_numbers = #tpu.dot_dimension_numbers<[1], [0], [0], [1], [0, 0, 1, 1], [], []>} : vector<16x16xf32>, vector<16x10xf32>, vector<16x10xf32> -> vector<16x10xf32>
    %cst_69 = arith.constant dense<0.000000e+00> : vector<16x10xf32>
    %124 = tpu.matmul %0, %123, %cst_69 {dimension_numbers = #tpu.dot_dimension_numbers<[1], [0], [0], [1], [0, 0, 1, 1], [], []>} : vector<16x16xf32>, vector<16x10xf32>, vector<16x10xf32> -> vector<16x10xf32>
    %125 = tpu.concatenate %122, %123, %124, %23, %24 in 1 : vector<16x10xf32>, vector<16x10xf32>, vector<16x10xf32>, vector<16x8xf32>, vector<16x1xf32> -> vector<16x39xf32>
    %126 = tpu.concatenate %121, %125 in 0 : vector<16x39xf32>, vector<16x39xf32> -> vector<32x39xf32>
    %c0_70 = arith.constant 0 : index
    %c0_71 = arith.constant 0 : index
    %127 = vector.load %arg13[%c0_70, %c0_71] : memref<39x64xf32, #tpu.memory_space<vmem>>, vector<39x64xf32>
    %cst_72 = arith.constant dense<0.000000e+00> : vector<32x64xf32>
    %128 = tpu.matmul %126, %127, %cst_72 {dimension_numbers = #tpu.dot_dimension_numbers<[1], [0], [0], [1], [0, 0, 1, 1], [], []>} : vector<32x39xf32>, vector<39x64xf32>, vector<32x64xf32> -> vector<32x64xf32>
    %129 = vector.extract_strided_slice %128 {offsets = [0, 0], sizes = [32, 8], strides = [1, 1]} : vector<32x64xf32> to vector<32x8xf32>
    %130 = vector.broadcast %56 : vector<32x1xf32> to vector<32x8xf32>
    %131 = arith.mulf %130, %129 : vector<32x8xf32>
    %132 = vector.extract_strided_slice %128 {offsets = [0, 8], sizes = [32, 8], strides = [1, 1]} : vector<32x64xf32> to vector<32x8xf32>
    %133 = vector.broadcast %57 : vector<32x1xf32> to vector<32x8xf32>
    %134 = arith.mulf %133, %132 : vector<32x8xf32>
    %135 = arith.addf %131, %134 : vector<32x8xf32>
    %136 = vector.extract_strided_slice %128 {offsets = [0, 16], sizes = [32, 8], strides = [1, 1]} : vector<32x64xf32> to vector<32x8xf32>
    %137 = vector.broadcast %58 : vector<32x1xf32> to vector<32x8xf32>
    %138 = arith.mulf %137, %136 : vector<32x8xf32>
    %139 = arith.addf %135, %138 : vector<32x8xf32>
    %140 = vector.extract_strided_slice %128 {offsets = [0, 24], sizes = [32, 8], strides = [1, 1]} : vector<32x64xf32> to vector<32x8xf32>
    %141 = vector.broadcast %59 : vector<32x1xf32> to vector<32x8xf32>
    %142 = arith.mulf %141, %140 : vector<32x8xf32>
    %143 = arith.addf %139, %142 : vector<32x8xf32>
    %144 = vector.extract_strided_slice %128 {offsets = [0, 32], sizes = [32, 8], strides = [1, 1]} : vector<32x64xf32> to vector<32x8xf32>
    %145 = vector.broadcast %60 : vector<32x1xf32> to vector<32x8xf32>
    %146 = arith.mulf %145, %144 : vector<32x8xf32>
    %147 = arith.addf %143, %146 : vector<32x8xf32>
    %148 = vector.extract_strided_slice %128 {offsets = [0, 40], sizes = [32, 8], strides = [1, 1]} : vector<32x64xf32> to vector<32x8xf32>
    %149 = vector.broadcast %61 : vector<32x1xf32> to vector<32x8xf32>
    %150 = arith.mulf %149, %148 : vector<32x8xf32>
    %151 = arith.addf %147, %150 : vector<32x8xf32>
    %152 = vector.extract_strided_slice %128 {offsets = [0, 48], sizes = [32, 8], strides = [1, 1]} : vector<32x64xf32> to vector<32x8xf32>
    %153 = vector.broadcast %62 : vector<32x1xf32> to vector<32x8xf32>
    %154 = arith.mulf %153, %152 : vector<32x8xf32>
    %155 = arith.addf %151, %154 : vector<32x8xf32>
    %156 = vector.extract_strided_slice %128 {offsets = [0, 56], sizes = [32, 8], strides = [1, 1]} : vector<32x64xf32> to vector<32x8xf32>
    %157 = vector.broadcast %63 : vector<32x1xf32> to vector<32x8xf32>
    %158 = arith.mulf %157, %156 : vector<32x8xf32>
    %159 = arith.addf %155, %158 : vector<32x8xf32>
    %160 = arith.addf %159, %54 : vector<32x8xf32>
    %161 = math.tanh %160 : vector<32x8xf32>
    %162 = tpu.concatenate %9, %11 in 0 : vector<16x8xf32>, vector<16x8xf32> -> vector<32x8xf32>
    %163 = arith.mulf %113, %162 : vector<32x8xf32>
    %cst_73 = arith.constant 1.000000e+00 : f32
    %164 = vector.broadcast %cst_73 : f32 to vector<32x8xf32>
    %165 = arith.subf %164, %113 : vector<32x8xf32>
    %166 = arith.mulf %165, %161 : vector<32x8xf32>
    %167 = arith.addf %163, %166 : vector<32x8xf32>
    %168 = vector.extract_strided_slice %167 {offsets = [0, 0], sizes = [16, 8], strides = [1, 1]} : vector<32x8xf32> to vector<16x8xf32>
    %c0_74 = arith.constant 0 : index
    %c0_75 = arith.constant 0 : index
    %c0_76 = arith.constant 0 : index
    %169 = vector.load %arg16[%c0_74, %c0_75, %c0_76] : memref<2x16x8xf32, #tpu.memory_space<vmem>>, vector<1x16x8xf32>
    %170 = vector.shape_cast %169 : vector<1x16x8xf32> to vector<16x8xf32>
    %171 = vector.shape_cast %168 : vector<16x8xf32> to vector<1x16x8xf32>
    tpu.vector_store %arg16[%c0_74, %c0_75, %c0_76], %171 {strides = array<i32>} : memref<2x16x8xf32, #tpu.memory_space<vmem>>, vector<1x16x8xf32>,
    %172 = vector.extract_strided_slice %167 {offsets = [16, 0], sizes = [16, 8], strides = [1, 1]} : vector<32x8xf32> to vector<16x8xf32>
    %c1_77 = arith.constant 1 : index
    %c0_78 = arith.constant 0 : index
    %c0_79 = arith.constant 0 : index
    %173 = vector.load %arg16[%c1_77, %c0_78, %c0_79] : memref<2x16x8xf32, #tpu.memory_space<vmem>>, vector<1x16x8xf32>
    %174 = vector.shape_cast %173 : vector<1x16x8xf32> to vector<16x8xf32>
    %175 = vector.shape_cast %172 : vector<16x8xf32> to vector<1x16x8xf32>
    tpu.vector_store %arg16[%c1_77, %c0_78, %c0_79], %175 {strides = array<i32>} : memref<2x16x8xf32, #tpu.memory_space<vmem>>, vector<1x16x8xf32>,
    return
  }
  func.func @transform_0(%arg0: i32) -> (i32, i32, i32) {
    %c0_i32 = arith.constant 0 : i32
    %c0_i32_0 = arith.constant 0 : i32
    %c0_i32_1 = arith.constant 0 : i32
    return %arg0, %c0_i32, %c0_i32_0 : i32, i32, i32
  }
  func.func @transform_1(%arg0: i32) -> (i32, i32, i32) {
    %c0_i32 = arith.constant 0 : i32
    %c0_i32_0 = arith.constant 0 : i32
    %c0_i32_1 = arith.constant 0 : i32
    return %arg0, %c0_i32, %c0_i32_0 : i32, i32, i32
  }
  func.func @transform_2(%arg0: i32) -> (i32, i32, i32) {
    %c0_i32 = arith.constant 0 : i32
    %c0_i32_0 = arith.constant 0 : i32
    %c0_i32_1 = arith.constant 0 : i32
    return %arg0, %c0_i32, %c0_i32_0 : i32, i32, i32
  }
  func.func @transform_3(%arg0: i32) -> (i32, i32, i32) {
    %c0_i32 = arith.constant 0 : i32
    %c0_i32_0 = arith.constant 0 : i32
    %c0_i32_1 = arith.constant 0 : i32
    return %arg0, %c0_i32, %c0_i32_0 : i32, i32, i32
  }
  func.func @transform_4(%arg0: i32) -> (i32, i32, i32) {
    %c0_i32 = arith.constant 0 : i32
    %c0_i32_0 = arith.constant 0 : i32
    %c0_i32_1 = arith.constant 0 : i32
    return %arg0, %c0_i32, %c0_i32_0 : i32, i32, i32
  }
  func.func @transform_5(%arg0: i32) -> (i32, i32, i32) {
    %c0_i32 = arith.constant 0 : i32
    %c0_i32_0 = arith.constant 0 : i32
    %c0_i32_1 = arith.constant 0 : i32
    return %arg0, %c0_i32, %c0_i32_0 : i32, i32, i32
  }
  func.func @transform_6(%arg0: i32) -> (i32, i32, i32) {
    %c0_i32 = arith.constant 0 : i32
    %c0_i32_0 = arith.constant 0 : i32
    %c0_i32_1 = arith.constant 0 : i32
    return %arg0, %c0_i32, %c0_i32_0 : i32, i32, i32
  }
  func.func @transform_7(%arg0: i32) -> (i32, i32) {
    %c0_i32 = arith.constant 0 : i32
    %c0_i32_0 = arith.constant 0 : i32
    %c0_i32_1 = arith.constant 0 : i32
    return %c0_i32, %c0_i32_0 : i32, i32
  }
  func.func @transform_8(%arg0: i32) -> (i32, i32) {
    %c0_i32 = arith.constant 0 : i32
    %c0_i32_0 = arith.constant 0 : i32
    %c0_i32_1 = arith.constant 0 : i32
    return %c0_i32, %c0_i32_0 : i32, i32
  }
  func.func @transform_9(%arg0: i32) -> (i32, i32) {
    %c0_i32 = arith.constant 0 : i32
    %c0_i32_0 = arith.constant 0 : i32
    %c0_i32_1 = arith.constant 0 : i32
    return %c0_i32, %c0_i32_0 : i32, i32
  }
  func.func @transform_10(%arg0: i32) -> (i32, i32) {
    %c0_i32 = arith.constant 0 : i32
    %c0_i32_0 = arith.constant 0 : i32
    %c0_i32_1 = arith.constant 0 : i32
    return %c0_i32, %c0_i32_0 : i32, i32
  }
  func.func @transform_11(%arg0: i32) -> (i32, i32) {
    %c0_i32 = arith.constant 0 : i32
    %c0_i32_0 = arith.constant 0 : i32
    %c0_i32_1 = arith.constant 0 : i32
    return %c0_i32, %c0_i32_0 : i32, i32
  }
  func.func @transform_12(%arg0: i32) -> (i32, i32) {
    %c0_i32 = arith.constant 0 : i32
    %c0_i32_0 = arith.constant 0 : i32
    %c0_i32_1 = arith.constant 0 : i32
    return %c0_i32, %c0_i32_0 : i32, i32
  }
  func.func @transform_13(%arg0: i32) -> (i32, i32) {
    %c0_i32 = arith.constant 0 : i32
    %c0_i32_0 = arith.constant 0 : i32
    %c0_i32_1 = arith.constant 0 : i32
    return %c0_i32, %c0_i32_0 : i32, i32
  }
  func.func @transform_14(%arg0: i32) -> (i32, i32) {
    %c0_i32 = arith.constant 0 : i32
    %c0_i32_0 = arith.constant 0 : i32
    %c0_i32_1 = arith.constant 0 : i32
    return %c0_i32, %c0_i32_0 : i32, i32
  }
  func.func @transform_15(%arg0: i32) -> (i32, i32, i32) {
    %c0_i32 = arith.constant 0 : i32
    %c0_i32_0 = arith.constant 0 : i32
    %c0_i32_1 = arith.constant 0 : i32
    return %arg0, %c0_i32, %c0_i32_0 : i32, i32, i32
  }
}

</mosaic_0001>

<bundles_post_ra>
// kernel: hohy_gcrnn_cell.1
= control target key start
LH: loop header
LB: loop body
LE: loop exit
PB: predicated region body
PF: predicated region fallthrough
CT: control target
= control target key end

     0   :  { %s1533_s26 = smov 2   ;;  %vm90_vm0 = vcmask 195584   ;;  %vm219_vm1 = vcmask 1044480   ;;  %vm141_vm2 = vcmask 15360   ;;  %vm200_vm3 = vcmask 39936   ;;  %s1535_s19 = smov 30   ;;  %s2332_s4 = inlined_call_operand.vmem [shape: f32[2,24,2], index: 4, kind: input, shape index: {}]   ;;  %s2333_s5 = inlined_call_operand.vmem [shape: f32[2,24,3], index: 5, kind: input, shape index: {}]   ;;  %s2334_s9 = inlined_call_operand.vmem [shape: f32[24,24], index: 9, kind: input, shape index: {}]   ;;  %s2335_s1 = inlined_call_operand.vmem [shape: f32[2,16,8], index: 1, kind: input, shape index: {}]   ;;  %s2336_s13 = inlined_call_operand.vmem [shape: f32[5,24], index: 13, kind: input, shape index: {}]   ;;  %s2337_s0 = inlined_call_operand.vmem [shape: f32[2,16,2], index: 0, kind: input, shape index: {}]   ;;  %s2338_s8 = inlined_call_operand.vmem [shape: f32[16,16], index: 8, kind: input, shape index: {}]   ;;  %s2339_s14 = inlined_call_operand.vmem [shape: f32[3,24], index: 14, kind: input, shape index: {}]   ;;  %s2340_s6 = inlined_call_operand.vmem [shape: f32[2,16,3], index: 6, kind: input, shape index: {}]   ;;  %s2341_s10 = inlined_call_operand.vmem [shape: f32[16,24], index: 10, kind: input, shape index: {}]   ;;  %s2342_s3 = inlined_call_operand.vmem [shape: f32[2,1,8], index: 3, kind: input, shape index: {}]   ;;  %s2343_s2 = inlined_call_operand.vmem [shape: f32[2,16,8], index: 2, kind: input, shape index: {}]   ;;  %s2344_s7 = inlined_call_operand.vmem [shape: f32[16,8], index: 7, kind: input, shape index: {}]   ;;  %s2345_s11 = inlined_call_operand.vmem [shape: f32[39,128], index: 11, kind: input, shape index: {}]   ;;  %s2346_s12 = inlined_call_operand.vmem [shape: f32[39,64], index: 12, kind: input, shape index: {}]   ;;  %s2347_s15 = inlined_call_operand.vmem [shape: f32[2,16,8], index: 15, kind: output, shape index: {}]  }
   0x1   :  { %v89_v0 = vld [vmem:[%s2332_s4 + $0x10] sm:$0xff]  ;;  %v88_v1 = vld [vmem:[%s2332_s4 + $0x8] sm:$0xff]  ;;  %v126_v2 = vld [vmem:[%s2333_s5] sm:$0xff]  ;;  %vm367_vm4 = vcmask 130048   ;;  %vm324_vm5 = vcmask 1042432   ;;  %vm311_vm6 = vcmask 23552  }
   0x2   :  { %113 = vmatpush.msra.mxu0 %v89_v0  ;;  %v87_v3 = vld [vmem:[%s2332_s4] sm:$0xff]  ;;  %132 = vrot.lane.b32.xlu0 %v126_v2, %s1533_s26  ;;  %v1404_v4 = vld [vmem:[%s2332_s4 + $0x28] sm:$0xff]  ;;  %v128_v7 = vld [vmem:[%s2333_s5 + $0x10] sm:$0xff]  ;;  %vm562_vm7 = vcmask 1046528   ;;  %s1538_s30 = smov 20   ;;  %vm444_vm8 = vcmask 80896  }
   0x3   :  { %v54_v5 = vld [vmem:[%s2334_s9] sm:$0xff]  ;;  %162 = vmatpush.msra.mxu1 %v1404_v4  ;;  %v1402_v8 = vld [vmem:[%s2332_s4 + $0x18] sm:$0xff]  ;;  %136 = vrot.lane.b32.xlu1 %v128_v7, %s1533_s26  ;;  %v127_v10 = vld [vmem:[%s2333_s5 + $0x8] sm:$0xff]  ;;  %vm447_vm9 = vcmask 162816   ;;  %vm450_vm10 = vcmask 244736   ;;  %vm453_vm11 = vcmask 310272  }
   0x4   :  { %114 = vmatpush.msra.mxu0 %v88_v1  ;;  %v1403_v6 = vld [vmem:[%s2332_s4 + $0x20] sm:$0xff]  ;;  %v1408_v11 = vld [vmem:[%s2333_s5 + $0x18] sm:$0xff]  ;;  %v55_v12 = vld [vmem:[%s2334_s9 + $0x8] sm:$0xff]  ;;  %vm549_vm12 = vcmask 318464   ;;  %s1546_s18 = smov 96   ;;  %s1548_s20 = smov 32  }
   0x5   :  { %163 = vmatpush.msra.mxu1 %v1403_v6  ;;  %v1409_v9 = vld [vmem:[%s2333_s5 + $0x20] sm:$0xff]  ;;  %v1410_v13 = vld [vmem:[%s2333_s5 + $0x28] sm:$0xff]  ;;  %v56_v16 = vld [vmem:[%s2334_s9 + $0x10] sm:$0xff]  ;;  %s1549_s5 = smov 16   ;;  %s1550_s21 = smov 64  }
   0x6   :  { %115 = vmatpush.msra.mxu0 %v87_v3  ;;  %184 = vrot.lane.b32.xlu2 %v1409_v9, %s1533_s26  ;;  %v1691_v14 = vld [vmem:[%s2335_s1 + $0x8] sm:$0xff]  ;;  %v1697_v15 = vld [vmem:[%s2335_s1] sm:$0xff]  ;;  %v1740_v35 = vld [vmem:[%s2335_s1 + $0x10] sm:$0xff]  ;;  %s1551_s22 = smov 48   ;;  %s1554_s28 = smov 88  }
   0x7   :  { %1399 = vmatmul.msk.f32.vlgmr.msra.gmra.mxu0 %vm90_vm0, %v54_v5  ;;  %164 = vmatpush.msra.mxu1 %v1402_v8  ;;  %v199_v17 = vld [vmem:[%s2336_s13] sm:$0x1f]  ;;  %v1718_v27 = vld [vmem:[%s2337_s0 + $0x8] sm:$0xff]  ;;  %v1745_v36 = vld [vmem:[%s2335_s1 + $0x18] sm:$0xff] }
   0x8   :  { %1405 = vmatmul.msk.f32.vlgmr.msra.gmra.mxu1 %vm90_vm0, %v54_v5  ;;  %1413 = vmatpush.msk.msra.mxu2 %vm219_vm1, %v199_v17  ;;  %v1723_v28 = vld [vmem:[%s2337_s0] sm:$0xff]  ;;  %v195_v49 = vld [vmem:[%s2340_s6 + $0x8] sm:$0xff]  ;;  %v1411_v51 = vld [vmem:[%s2340_s6 + $0x10] sm:$0xff] }
   0x9   :  { %v1760_v44 = vld [vmem:[%s2338_s8] sm:$0xff]  ;;  %v1412_v54 = vld [vmem:[%s2340_s6 + $0x18] sm:$0xff]  ;;  %v58_v55 = vld [vmem:[%s2341_s10 + $0x8] sm:$0xff] }
   0xa   :  { %134 = vrot.lane.b32.xlu0 %v127_v10, %s1533_s26  ;;  %v258_v46 = vld [vmem:[%s2339_s14] sm:$0x7]  ;;  %v1794_v58 = vld [vmem:[%s2337_s0 + $0x18] sm:$0xff]  ;;  %v1799_v59 = vld [vmem:[%s2337_s0 + $0x10] sm:$0xff]  ;;  %s1556_s0 = smov 8  }
   0xb   :  { %182 = vrot.lane.b32.xlu1 %v1408_v11, %s1533_s26  ;;  %v194_v47 = vld [vmem:[%s2340_s6] sm:$0xff]  ;;  %1424 = vmatpush.msk.msrb.mxu0 %vm324_vm5, %v258_v46  ;;  %v1816_v0 = vld [vmem:[%s2338_s8 + $0x8] sm:$0xff]  ;;  %v1544_v46 = vmov 0  }
   0xc   :  { %v57_v52 = vld [vmem:[%s2341_s10] sm:$0xff]  ;;  %s1534_s10 = smov 10  }
   0xd   :  { %v69_v7 = vld [vmem:[%s2343_s2] sm:$0xff] }
   0xe   :  { %186 = vrot.lane.b32.xlu2 %v1410_v13, %s1533_s26  ;;  %v1503_v8 = vld [vmem:[%s2342_s3] ss:$0 sm:$0xff]  ;;  %v1504_v17 = vld [vmem:[%s2342_s3 + $0x1] ss:$0 sm:$0xff] }
   0xf   :  { %1400 = vmatmul.msk.f32.gmra.mxu0 %vm90_vm0, %v55_v12  ;;  %v75_v9 = vmul.f32 %v1503_v8, %v69_v7 }
  0x10   :  { %1406 = vmatmul.msk.f32.gmra.mxu1 %vm90_vm0, %v55_v12  ;;  %v70_v12 = vld [vmem:[%s2343_s2 + $0x8] sm:$0xff] }
  0x11   :  { %v76_v13 = vmul.f32 %v1503_v8, %v70_v12 }
  0x12   :  { %361 = vrot.lane.b32.xlu0 %v1691_v14, %s1533_s26 }
  0x13   :  { %359 = vrot.lane.b32.xlu1 %v1697_v15, %s1533_s26 }
  0x16   :  { %460 = vrot.lane.b32.xlu2 %v1745_v36, %s1533_s26 }
  0x17   :  { %1401 = vmatmul.msk.f32.gmra.mxu0 %vm90_vm0, %v56_v16 }
  0x18   :  { %1407 = vmatmul.msk.f32.gmra.mxu1 %vm90_vm0, %v56_v16  ;;  %v1396_v16 = vld [vmem:[%s2343_s2 + $0x10] sm:$0xff] }
  0x1a   :  { %458 = vrot.lane.b32.xlu0 %v1740_v35, %s1533_s26 }
  0x1f   :  { %1425 = vmatmul.msk.f32.vlgmr.msrb.gmra.mxu0 %vm311_vm6, %v194_v47 }
  0x22   :  { %438 = vrot.lane.b32.xlu0 %v75_v9, %s1535_s19 }
  0x27   :  { %1426 = vmatmul.msk.f32.gmra.mxu0 %vm311_vm6, %v195_v49 }
  0x2a   :  { %440 = vrot.lane.b32.xlu0 %v76_v13, %s1535_s19 }
  0x2f   :  { %1427 = vmatmul.msk.f32.gmra.mxu0 %vm311_vm6, %v1411_v51 }
  0x37   :  { %1428 = vmatmul.msk.f32.gmra.mxu0 %vm311_vm6, %v1412_v54 }
  0x60   :  { %v185_v38 = vpop.permute.xlu2 %184 }
  0x68   :  { %v187_v41 = vpop.permute.xlu2 %186 }
  0x70   :  { %v461_v56 = vpop.permute.xlu2 %460 }
  0x71   :  { %v1803_v60 = vsel %vm141_vm2, %v1794_v58, %v461_v56 }
  0x72   :  { %480 = vmatpush.msrb.mxu1 %v1803_v60 }
  0x74   :  { %v133_v18 = vpop.permute.xlu0 %132 }
  0x75   :  { %v137_v19 = vpop.permute.xlu1 %136 }
  0x7c   :  { %v135_v22 = vpop.permute.xlu0 %134 }
  0x7d   :  { %v183_v23 = vpop.permute.xlu1 %182 }
  0x84   :  { %v117_v20 = vpop.f32.mrf.mxu0  ;;  %v362_v26 = vpop.permute.xlu0 %361 }
  0x85   :  { %v142_v21 = vsel %vm141_vm2, %v117_v20, %v133_v18  ;;  %v360_v29 = vpop.permute.xlu1 %359  ;;  %v1727_v30 = vsel %vm141_vm2, %v1718_v27, %v362_v26  ;;  %v166_v33 = vpop.f32.mrf.mxu1  ;;  %v85_v18 = vmul.f32 %v1504_v17, %v1396_v16  ;;  %v1537_v26 = vmov 2  }
  0x86   :  { %1414 = vmatmul.msk.f32.vlgmr.msra.gmra.mxu2 %vm200_vm3, %v142_v21  ;;  %v1732_v31 = vsel %vm141_vm2, %v1723_v28, %v360_v29  ;;  %v191_v37 = vsel %vm141_vm2, %v166_v33, %v183_v23  ;;  %v1867_v21 = vld [vmem:[%s2344_s7 + $0x8] sm:$0xff]  ;;  %v548_v23 = vld [vmem:[%s2345_s11 + $0x20] sm:$0x7f]  ;;  %1489 = vset.pattern.permute.xlu0 %v1537_v26 }
  0x87   :  { %388 = vmatpush.msrb.mxu2 %v1727_v30  ;;  %530 = vrot.lane.b32.xlu0 %v85_v18, %s1535_s19 }
  0x89   :  { %389 = vmatpush.msrb.mxu2 %v1732_v31 }
  0x8c   :  { %v120_v24 = vpop.f32.mrf.mxu0  ;;  %v459_v57 = vpop.permute.xlu0 %458 }
  0x8d   :  { %v143_v25 = vsel %vm141_vm2, %v120_v24, %v135_v22  ;;  %v169_v39 = vpop.f32.mrf.mxu1  ;;  %v1807_v61 = vsel %vm141_vm2, %v1799_v59, %v459_v57  ;;  %v1536_v22 = vmov 1   ;;  %v547_v24 = vld [vmem:[%s2345_s11 + $0x18] sm:$0xff] }
  0x8e   :  { %1415 = vmatmul.msk.f32.gmra.mxu2 %vm200_vm3, %v143_v25  ;;  %v192_v40 = vsel %vm141_vm2, %v169_v39, %v185_v38  ;;  %481 = vmatpush.msrb.mxu1 %v1807_v61  ;;  %v546_v25 = vld [vmem:[%s2345_s11 + $0x10] sm:$0xff]  ;;  %v1540_v38 = vmov 5  }
  0x8f   :  { %1433 = vmatmul.msk.f32.vlgmr.msrb.gmra.mxu1 %vm367_vm4, %v1760_v44  ;;  %1487 = vset.pattern.permute.xlu1 %v1536_v22 }
  0x90   :  { %1488 = vset.pattern.permute.xlu2 %v1536_v22 }
  0x94   :  { %v123_v32 = vpop.f32.mrf.mxu0 }
  0x95   :  { %v144_v34 = vsel %vm141_vm2, %v123_v32, %v137_v19  ;;  %v172_v42 = vpop.f32.mrf.mxu1  ;;  %v1397_v19 = vld [vmem:[%s2343_s2 + $0x18] sm:$0xff]  ;;  %v52_v32 = vld [vmem:[%s2344_s7] sm:$0xff]  ;;  %s1555_s2 = smov 72  }
  0x96   :  { %1416 = vmatmul.msk.f32.gmra.mxu2 %vm200_vm3, %v144_v34  ;;  %v193_v43 = vsel %vm141_vm2, %v172_v42, %v187_v41  ;;  %v86_v20 = vmul.f32 %v1504_v17, %v1397_v19  ;;  %v1541_v41 = vmov 6   ;;  %v544_v42 = vld [vmem:[%s2345_s11] sm:$0xff] }
  0x97   :  { %1434 = vmatmul.msk.f32.gmra.mxu1 %vm367_vm4, %v1816_v0 }
  0x98   :  { %532 = vrot.lane.b32.xlu0 %v86_v20, %s1535_s19  ;;  %s1547_s19 = smov 112  }
  0x9e   :  { %1417 = vmatmul.msk.f32.gmra.mxu2 %vm200_vm3, %v191_v37  ;;  %v1539_v37 = vmov 3  }
  0xa0   :  { %646 = vperm.xlu0 %1489, %v1867_v21  }
  0xa6   :  { %1418 = vmatmul.msk.f32.gmra.mxu2 %vm200_vm3, %v192_v40  ;;  %v545_v40 = vld [vmem:[%s2345_s11 + $0x8] sm:$0xff]  ;;  %s1545_s11 = smov 80  }
  0xae   :  { %1419 = vmatmul.msk.f32.gmra.mxu2 %vm200_vm3, %v193_v43  ;;  %v1542_v43 = vmov 7  }
  0xb6   :  { %1429 = vmatmul.msk.f32.vlgmr.msrb.gmra.mxu2 %vm367_vm4, %v1760_v44 }
 0x109   :  { %v240_v45 = vpop.f32.mrf.mxu2 }
 0x10c   :  { %v483_v3 = vpop.f32.mrf.mxu1 }
 0x111   :  { %v243_v48 = vpop.f32.mrf.mxu2 }
 0x114   :  { %v486_v5 = vpop.f32.mrf.mxu1 }
 0x115   :  { %503 = vmatpush.msra.mxu2 %v486_v5 }
 0x117   :  { %504 = vmatpush.msra.mxu2 %v483_v3 }
 0x118   :  { %1435 = vmatmul.msk.f32.vlgmr.msra.gmra.mxu2 %vm367_vm4, %v1760_v44 }
 0x119   :  { %v246_v50 = vpop.f32.mrf.mxu2 }
 0x11a   :  { %278 = vmatpush.msra.mxu3 %v246_v50 }
 0x11c   :  { %279 = vmatpush.msra.mxu3 %v243_v48  ;;  %v1898_v48 = vpop.permute.xlu0 %438 }
 0x11e   :  { %280 = vmatpush.msra.mxu3 %v240_v45  ;;  %v1543_v45 = vmov 4  }
 0x11f   :  { %1420 = vmatmul.msk.f32.vlgmr.msra.gmra.mxu3 %vm90_vm0, %v57_v52  ;;  %1494 = vset.pattern.permute.xlu0 %v1543_v45 }
 0x120   :  { %1436 = vmatmul.msk.f32.gmra.mxu2 %vm367_vm4, %v1816_v0  ;;  %706 = vperm.xlu0 %1494, %v52_v32  }
 0x121   :  { %v249_v53 = vpop.f32.mrf.mxu2 }
 0x127   :  { %1421 = vmatmul.msk.f32.gmra.mxu3 %vm90_vm0, %v58_v55 }
 0x128   :  { %1499 = vset.pattern.permute.xlu0 %v1542_v43 }
 0x129   :  { %v252_v62 = vpop.f32.mrf.mxu2  ;;  %806 = vperm.xlu0 %1499, %v1867_v21  }
 0x131   :  { %v255_v63 = vpop.f32.mrf.mxu2 }
 0x132   :  { %301 = vmatpush.msrb.mxu3 %v255_v63 }
 0x134   :  { %302 = vmatpush.msrb.mxu3 %v252_v62 }
 0x136   :  { %303 = vmatpush.msrb.mxu3 %v249_v53 }
 0x137   :  { %1422 = vmatmul.msk.f32.vlgmr.msrb.gmra.mxu3 %vm90_vm0, %v57_v52 }
 0x138   :  { %1461 = vmatpush.msra.mxu3 %v1727_v30 }
 0x139   :  { %v391_v1 = vpop.f32.mrf.mxu2 }
 0x13a   :  { %422 = vrot.lane.b32.xlu1 %v391_v1, %s1534_s10  ;;  %1462 = vmatpush.msra.mxu3 %v1732_v31 }
 0x13f   :  { %1423 = vmatmul.msk.f32.gmra.mxu3 %vm90_vm0, %v58_v55  ;;  %v1907_v55 = vpop.permute.xlu0 %440 }
 0x147   :  { %1430 = vmatmul.msk.f32.vlgmr.msra.gmra.mxu3 %vm367_vm4, %v1816_v0 }
 0x19b   :  { %v506_v34 = vpop.f32.mrf.mxu2 }
 0x1a2   :  { %v1827_v2 = vpop.f32.mrf.mxu3 }
 0x1a3   :  { %v509_v39 = vpop.f32.mrf.mxu2 }
 0x1aa   :  { %v1829_v4 = vpop.f32.mrf.mxu3 }
 0x1ac   :  { %v423_v47 = vpop.permute.xlu1 %422 }
 0x1ad   :  { %v445_v49 = vsel %vm444_vm8, %v1732_v31, %v423_v47 }
 0x1ba   :  { %v1831_v6 = vpop.f32.mrf.mxu3 }
 0x1c2   :  { %v1841_v10 = vpop.f32.mrf.mxu3 }
 0x1ca   :  { %v394_v11 = vpop.f32.mrf.mxu3 }
 0x1cb   :  { %411 = vmatpush.msrb.mxu3 %v394_v11  ;;  %424 = vrot.lane.b32.xlu1 %v394_v11, %s1534_s10 }
 0x1cd   :  { %412 = vmatpush.msrb.mxu3 %v391_v1 }
 0x1ce   :  { %1431 = vmatmul.msk.f32.vlgmr.msrb.gmra.mxu3 %vm367_vm4, %v1760_v44 }
 0x1cf   :  { %1437 = vmatpush.msk.msra.mxu3 %vm562_vm7, %v548_v23 }
 0x1d1   :  { %578 = vmatpush.msra.mxu3 %v547_v24 }
 0x1d3   :  { %514 = vrot.lane.b32.xlu1 %v483_v3, %s1534_s10  ;;  %579 = vmatpush.msra.mxu3 %v546_v25  ;;  %v1917_v3 = vpop.permute.xlu0 %530 }
 0x1d5   :  { %580 = vmatpush.msra.mxu3 %v545_v40 }
 0x1d6   :  { %1432 = vmatmul.msk.f32.gmra.mxu3 %vm367_vm4, %v1816_v0 }
 0x1d7   :  { %581 = vmatpush.msra.mxu3 %v544_v42 }
 0x1db   :  { %516 = vrot.lane.b32.xlu1 %v486_v5, %s1534_s10  ;;  %v1927_v12 = vpop.permute.xlu0 %532 }
 0x1e3   :  { %614 = vperm.xlu1 %1487, %v1867_v21  }
 0x1eb   :  { %1490 = vset.pattern.permute.xlu1 %v1537_v26  ;;  %v1952_v26 = vpop.permute.xlu0 %646 }
 0x1ec   :  { %642 = vperm.xlu1 %1490, %v52_v32  }
 0x1f4   :  { %1492 = vset.pattern.permute.xlu1 %v1539_v37 }
 0x1f5   :  { %674 = vperm.xlu1 %1492, %v52_v32  }
 0x1fd   :  { %1495 = vset.pattern.permute.xlu1 %v1540_v38 }
 0x1fe   :  { %742 = vperm.xlu1 %1495, %v1867_v21  }
 0x206   :  { %1497 = vset.pattern.permute.xlu1 %v1541_v41 }
 0x207   :  { %774 = vperm.xlu1 %1497, %v1867_v21  }
 0x20f   :  { %1500 = vset.pattern.permute.xlu1 %v1542_v43 }
 0x210   :  { %802 = vperm.xlu1 %1500, %v52_v32  }
 0x218   :  { %1502 = vset.pattern.permute.xlu1 %v1544_v46 }
 0x219   :  { %597 = vperm.xlu1 %1502, %v52_v32  }
 0x23d   :  { %v425_v51 = vpop.permute.xlu1 %424 }
 0x23e   :  { %v446_v31 = vsel %vm444_vm8, %v1727_v30, %v425_v51 }
 0x245   :  { %v515_v63 = vpop.permute.xlu1 %514 }
 0x246   :  { %v536_v5 = vsel %vm444_vm8, %v1807_v61, %v515_v63 }
 0x24d   :  { %v517_v11 = vpop.permute.xlu1 %516 }
 0x24e   :  { %v537_v13 = vsel %vm444_vm8, %v1803_v60, %v517_v11 }
 0x251   :  { %v414_v29 = vpop.f32.mrf.mxu3 }
 0x252   :  { %430 = vrot.lane.b32.xlu2 %v414_v29, %s1538_s30 }
 0x255   :  { %v1936_v19 = vpop.permute.xlu1 %614 }
 0x259   :  { %v417_v33 = vpop.f32.mrf.mxu3 }
 0x25a   :  { %432 = vrot.lane.b32.xlu2 %v417_v33, %s1538_s30 }
 0x262   :  { %522 = vrot.lane.b32.xlu2 %v506_v34, %s1538_s30 }
 0x26a   :  { %524 = vrot.lane.b32.xlu2 %v509_v39, %s1538_s30  ;;  %v1969_v39 = vpop.permute.xlu0 %706 }
 0x272   :  { %610 = vperm.xlu2 %1488, %v52_v32  }
 0x27a   :  { %1491 = vset.pattern.permute.xlu2 %v1539_v37 }
 0x27b   :  { %678 = vperm.xlu2 %1491, %v1867_v21  }
 0x283   :  { %1493 = vset.pattern.permute.xlu2 %v1543_v45 }
 0x284   :  { %710 = vperm.xlu2 %1493, %v1867_v21  }
 0x28c   :  { %1496 = vset.pattern.permute.xlu2 %v1540_v38 }
 0x28d   :  { %738 = vperm.xlu2 %1496, %v52_v32  }
 0x295   :  { %1498 = vset.pattern.permute.xlu2 %v1541_v41 }
 0x296   :  { %770 = vperm.xlu2 %1498, %v52_v32  }
 0x29e   :  { %1501 = vset.pattern.permute.xlu2 %v1544_v46 }
 0x29f   :  { %602 = vperm.xlu2 %1501, %v1867_v21   ;;  %v1940_v21 = vpop.permute.xlu1 %642 }
 0x2a7   :  { %v1944_v23 = vpop.permute.xlu1 %674 }
 0x2ac   :  { %v431_v50 = vpop.permute.xlu2 %430 }
 0x2ad   :  { %v448_v52 = vsel %vm447_vm9, %v445_v49, %v431_v50 }
 0x2ae   :  { %v451_v53 = vsel %vm450_vm10, %v448_v52, %v1898_v48 }
 0x2af   :  { %v454_v54 = vsel %vm453_vm11, %v451_v53, 1.0  ;;  %v1948_v24 = vpop.permute.xlu1 %742  ;;  %v2002_v53 = vpop.permute.xlu0 %806 }
 0x2b0   :  { %1438 = vmatmul.msk.f32.vlgmr.msra.gmra.mxu3 %vm549_vm12, %v454_v54 }
 0x2b4   :  { %v433_v56 = vpop.permute.xlu2 %432 }
 0x2b5   :  { %v449_v57 = vsel %vm447_vm9, %v446_v31, %v433_v56 }
 0x2b6   :  { %v452_v62 = vsel %vm450_vm10, %v449_v57, %v1907_v55 }
 0x2b7   :  { %v455_v1 = vsel %vm453_vm11, %v452_v62, 1.0  ;;  %v1954_v29 = vpop.permute.xlu1 %774 }
 0x2b8   :  { %1439 = vmatmul.msk.f32.gmra.mxu3 %vm549_vm12, %v455_v1 }
 0x2bc   :  { %v523_v7 = vpop.permute.xlu2 %522 }
 0x2bd   :  { %v538_v30 = vsel %vm447_vm9, %v536_v5, %v523_v7 }
 0x2be   :  { %v540_v8 = vsel %vm450_vm10, %v538_v30, %v1917_v3 }
 0x2bf   :  { %v542_v9 = vsel %vm453_vm11, %v540_v8, 1.0  ;;  %v1971_v40 = vpop.permute.xlu1 %802 }
 0x2c0   :  { %1440 = vmatmul.msk.f32.gmra.mxu3 %vm549_vm12, %v542_v9 }
 0x2c4   :  { %v525_v16 = vpop.permute.xlu2 %524 }
 0x2c5   :  { %v539_v61 = vsel %vm447_vm9, %v537_v13, %v525_v16 }
 0x2c6   :  { %v541_v17 = vsel %vm450_vm10, %v539_v61, %v1927_v12 }
 0x2c7   :  { %v543_v18 = vsel %vm453_vm11, %v541_v17, 1.0 }
 0x2c8   :  { %1441 = vmatmul.msk.f32.gmra.mxu3 %vm549_vm12, %v543_v18 }
 0x2cc   :  { %v1938_v20 = vpop.permute.xlu2 %610 }
 0x2d5   :  { %v1942_v22 = vpop.permute.xlu2 %678 }
 0x2de   :  { %v1946_v60 = vpop.permute.xlu2 %710 }
 0x2e7   :  { %v1950_v25 = vpop.permute.xlu2 %738 }
 0x2f0   :  { %v1967_v38 = vpop.permute.xlu2 %770 }
 0x333   :  { %v1956_v32 = vpop.f32.mrf.mxu3 }
 0x334   :  { %v681_v33 = vmul.f32 %v1944_v23, %v1956_v32  ;;  %v649_v34 = vmul.f32 %v1940_v21, %v1956_v32  ;;  %v617_v37 = vmul.f32 %v1938_v20, %v1956_v32  ;;  %v777_v41 = vmul.f32 %v1967_v38, %v1956_v32 }
 0x335   :  { %v809_v42 = vmul.f32 %v1971_v40, %v1956_v32  ;;  %v713_v43 = vmul.f32 %v1969_v39, %v1956_v32  ;;  %v745_v49 = vmul.f32 %v1950_v25, %v1956_v32 }
 0x336   :  { %689 = vrot.lane.b32.xlu1 %v681_v33, %s1545_s11  ;;  %657 = vrot.lane.b32.xlu2 %v649_v34, %s1546_s18  ;;  %v2056_v33 = vpop.permute.xlu2 %602 }
 0x337   :  { %625 = vrot.lane.b32.xlu0 %v617_v37, %s1547_s19 }
 0x33b   :  { %v1982_v45 = vpop.f32.mrf.mxu3 }
 0x33c   :  { %v650_v46 = vmul.f32 %v1952_v26, %v1982_v45  ;;  %v618_v47 = vmul.f32 %v1936_v19, %v1982_v45  ;;  %v746_v50 = vmul.f32 %v1948_v24, %v1982_v45  ;;  %v714_v51 = vmul.f32 %v1946_v60, %v1982_v45 }
 0x33d   :  { %v682_v52 = vmul.f32 %v1942_v22, %v1982_v45  ;;  %v778_v31 = vmul.f32 %v1954_v29, %v1982_v45  ;;  %v810_v56 = vmul.f32 %v2002_v53, %v1982_v45 }
 0x33e   :  { %785 = vrot.lane.b32.xlu1 %v777_v41, %s1548_s20  ;;  %817 = vrot.lane.b32.xlu2 %v809_v42, %s1549_s5  ;;  %v2058_v41 = vpop.permute.xlu1 %597 }
 0x33f   :  { %721 = vrot.lane.b32.xlu0 %v713_v43, %s1550_s21 }
 0x343   :  { %v2004_v54 = vpop.f32.mrf.mxu3 }
 0x344   :  { %v651_v57 = vmul.f32 %v1940_v21, %v2004_v54  ;;  %v747_v62 = vmul.f32 %v1950_v25, %v2004_v54  ;;  %v619_v63 = vmul.f32 %v1938_v20, %v2004_v54  ;;  %v683_v1 = vmul.f32 %v1944_v23, %v2004_v54 }
 0x345   :  { %v715_v7 = vmul.f32 %v1969_v39, %v2004_v54  ;;  %v779_v17 = vmul.f32 %v1967_v38, %v2004_v54  ;;  %v811_v18 = vmul.f32 %v1971_v40, %v2004_v54 }
 0x346   :  { %659 = vrot.lane.b32.xlu1 %v650_v46, %s1546_s18  ;;  %627 = vrot.lane.b32.xlu2 %v618_v47, %s1547_s19  ;;  %v605_v47 = vmul.f32 %v2058_v41, %v1956_v32 }
 0x347   :  { %753 = vrot.lane.b32.xlu0 %v745_v49, %s1551_s22 }
 0x34b   :  { %v2024_v5 = vpop.f32.mrf.mxu3 }
 0x34c   :  { %v684_v30 = vmul.f32 %v1942_v22, %v2024_v5  ;;  %v652_v8 = vmul.f32 %v1952_v26, %v2024_v5  ;;  %v716_v9 = vmul.f32 %v1946_v60, %v2024_v5  ;;  %v620_v11 = vmul.f32 %v1936_v19, %v2024_v5 }
 0x34d   :  { %v748_v13 = vmul.f32 %v1948_v24, %v2024_v5  ;;  %v812_v16 = vmul.f32 %v2002_v53, %v2024_v5  ;;  %v780_v61 = vmul.f32 %v1954_v29, %v2024_v5 }
 0x34e   :  { %755 = vrot.lane.b32.xlu1 %v746_v50, %s1551_s22  ;;  %723 = vrot.lane.b32.xlu2 %v714_v51, %s1550_s21 }
 0x34f   :  { %691 = vrot.lane.b32.xlu0 %v682_v52, %s1545_s11 }
 0x356   :  { %787 = vrot.lane.b32.xlu1 %v778_v31, %s1548_s20  ;;  %819 = vrot.lane.b32.xlu2 %v810_v56, %s1549_s5 }
 0x357   :  { %661 = vrot.lane.b32.xlu0 %v651_v57, %s1546_s18 }
 0x35e   :  { %757 = vrot.lane.b32.xlu1 %v747_v62, %s1551_s22  ;;  %629 = vrot.lane.b32.xlu2 %v619_v63, %s1547_s19 }
 0x35f   :  { %693 = vrot.lane.b32.xlu0 %v683_v1, %s1545_s11 }
 0x366   :  { %725 = vrot.lane.b32.xlu2 %v715_v7, %s1550_s21  ;;  %695 = vrot.lane.b32.xlu1 %v684_v30, %s1545_s11  ;;  %v345_v30 = vpop.f32.mrf.mxu0 }
 0x367   :  { %663 = vrot.lane.b32.xlu0 %v652_v8, %s1546_s18  ;;  %v606_v8 = vmul.f32 %v2056_v33, %v1982_v45 }
 0x36e   :  { %727 = vrot.lane.b32.xlu1 %v716_v9, %s1550_s21  ;;  %631 = vrot.lane.b32.xlu2 %v620_v11, %s1547_s19  ;;  %v2065_v11 = vadd.f32 %v345_v30, %v1827_v2 }
 0x36f   :  { %759 = vrot.lane.b32.xlu0 %v748_v13, %s1551_s22 }
 0x376   :  { %823 = vrot.lane.b32.xlu1 %v812_v16, %s1549_s5  ;;  %791 = vrot.lane.b32.xlu2 %v780_v61, %s1548_s20 }
 0x377   :  { %789 = vrot.lane.b32.xlu0 %v779_v17, %s1548_s20 }
 0x37e   :  { %821 = vrot.lane.b32.xlu2 %v811_v18, %s1549_s5 }
 0x390   :  { %v658_v34 = vpop.permute.xlu2 %657 }
 0x398   :  { %v818_v37 = vpop.permute.xlu2 %817 }
 0x3a0   :  { %v628_v42 = vpop.permute.xlu2 %627 }
 0x3a1   :  { %v638_v32 = vadd.f32 %v628_v42, %v606_v8 }
 0x3a8   :  { %v690_v43 = vpop.permute.xlu1 %689  ;;  %v724_v50 = vpop.permute.xlu2 %723 }
 0x3a9   :  { %v626_v46 = vpop.permute.xlu0 %625 }
 0x3aa   :  { %v637_v49 = vadd.f32 %v626_v46, %v605_v47 }
 0x3ac   :  { %v669_v31 = vadd.f32 %v658_v34, %v637_v49 }
 0x3ae   :  { %v701_v56 = vadd.f32 %v690_v43, %v669_v31 }
 0x3b0   :  { %v786_v51 = vpop.permute.xlu1 %785  ;;  %v820_v62 = vpop.permute.xlu2 %819 }
 0x3b1   :  { %v722_v52 = vpop.permute.xlu0 %721 }
 0x3b2   :  { %v733_v57 = vadd.f32 %v722_v52, %v701_v56  ;;  %v348_v52 = vpop.f32.mrf.mxu0 }
 0x3b3   :  { %v2069_v2 = vadd.f32 %v348_v52, %v1829_v4 }
 0x3b8   :  { %v660_v63 = vpop.permute.xlu1 %659  ;;  %v630_v43 = vpop.permute.xlu2 %629 }
 0x3b9   :  { %v754_v1 = vpop.permute.xlu0 %753  ;;  %v670_v61 = vadd.f32 %v660_v63, %v638_v32 }
 0x3ba   :  { %v765_v7 = vadd.f32 %v754_v1, %v733_v57 }
 0x3bc   :  { %v797_v9 = vadd.f32 %v786_v51, %v765_v7 }
 0x3be   :  { %v829_v13 = vadd.f32 %v818_v37, %v797_v9 }
 0x3c0   :  { %v833_v16 = vadd.f32 %v829_v13, %v2065_v11  ;;  %v756_v17 = vpop.permute.xlu1 %755  ;;  %v726_v57 = vpop.permute.xlu2 %725 }
 0x3c1   :  { %v692_v18 = vpop.permute.xlu0 %691 }
 0x3c2   :  { %v1442_v34 = vmul.f32 -1.442695, %v833_v16  ;;  %v702_v46 = vadd.f32 %v692_v18, %v670_v61  ;;  %v608_v16 = vmul.f32 %v2056_v33, %v2024_v5 }
 0x3c4   :  { %1505 = vpow2.f32 %v1442_v34  ;;  %v734_v47 = vadd.f32 %v724_v50, %v702_v46 }
 0x3c6   :  { %v766_v49 = vadd.f32 %v756_v17, %v734_v47  ;;  %v607_v47 = vmul.f32 %v2058_v41, %v2004_v54 }
 0x3c8   :  { %v788_v31 = vpop.permute.xlu1 %787  ;;  %v632_v9 = vpop.permute.xlu2 %631 }
 0x3c9   :  { %v798_v45 = vadd.f32 %v788_v31, %v766_v49  ;;  %v662_v51 = vpop.permute.xlu0 %661  ;;  %v640_v34 = vadd.f32 %v632_v9, %v608_v16 }
 0x3ca   :  { %v1506_v56 = vpop.eup %1505 }
 0x3cb   :  { %v849_v37 = vadd.f32 1.0, %v1506_v56  ;;  %v830_v42 = vadd.f32 %v820_v62, %v798_v45  ;;  %v351_v45 = vpop.f32.mrf.mxu0  ;;  %v639_v56 = vadd.f32 %v630_v43, %v607_v47 }
 0x3cd   :  { %1507 = vrcp.f32 %v849_v37  ;;  %v834_v63 = vadd.f32 %v830_v42, %v2069_v2  ;;  %v864_v4 = vand.u32 2147483648, %v849_v37  ;;  %v862_v18 = vand.u32 2147483647, %v849_v37 }
 0x3ce   :  { %vm858_vm14 = vweird.f32 %v849_v37 }
 0x3cf   :  { %v1443_v1 = vmul.f32 -1.442695, %v834_v63  ;;  %v865_v31 = vor.u32 1.1754944e-38, %v864_v4  ;;  %vm863_vm0 = vcmp.eq.f32.partialorder %v862_v18, 8.507059e+37  ;;  %v671_v63 = vadd.f32 %v662_v51, %v639_v56 }
 0x3d0   :  { %v758_v7 = vpop.permute.xlu1 %757 }
 0x3d1   :  { %1509 = vpow2.f32 %v1443_v1  ;;  %v694_v30 = vpop.permute.xlu0 %693 }
 0x3d3   :  { %v1508_v50 = vpop.eup %1507 }
 0x3d4   :  { %v854_v8 = vmul.f32 %v1508_v50, %v849_v37  ;;  %vm859_vm13 = vweird.f32 %v1508_v50  ;;  %v792_v37 = vpop.permute.xlu2 %791 }
 0x3d5   :  { %vm860_vm15 = vmor %vm858_vm14, %vm859_vm13 }
 0x3d6   :  { %v855_v32 = vsub.f32 1.0, %v854_v8 }
 0x3d7   :  { %v1510_v13 = vpop.eup %1509 }
 0x3d8   :  { %v850_v61 = vadd.f32 1.0, %v1510_v13  ;;  %v696_v17 = vpop.permute.xlu1 %695  ;;  %v856_v62 = vmul.f32 %v1508_v50, %v855_v32  ;;  %v703_v32 = vadd.f32 %v694_v30, %v671_v63 }
 0x3d9   :  { %v664_v46 = vpop.permute.xlu0 %663 }
 0x3da   :  { %1511 = vrcp.f32 %v850_v61  ;;  %v857_v49 = vadd.f32 %v1508_v50, %v856_v62  ;;  %v672_v52 = vadd.f32 %v664_v46, %v640_v34  ;;  %v879_v18 = vand.u32 2147483648, %v850_v61  ;;  %v354_v46 = vpop.f32.mrf.mxu0 }
 0x3db   :  { %v877_v51 = vand.u32 2147483647, %v850_v61  ;;  %vm873_vm3 = vweird.f32 %v850_v61 }
 0x3dc   :  { %v861_v5 = vsel %vm860_vm15, %v1508_v50, %v857_v49  ;;  %v704_v8 = vadd.f32 %v696_v17, %v672_v52  ;;  %v735_v50 = vadd.f32 %v726_v57, %v703_v32  ;;  %v880_v49 = vor.u32 1.1754944e-38, %v879_v18 }
 0x3dd   :  { %v2076_v42 = vsel %vm863_vm0, %v865_v31, %v861_v5  ;;  %v2082_v52 = vadd.f32 %v354_v46, %v1841_v10  ;;  %vm878_vm6 = vcmp.eq.f32.partialorder %v877_v51, 8.507059e+37 }
 0x3de   :  { %v913_v1 = vmul.f32 %v2076_v42, %v1697_v15  ;;  %v767_v30 = vadd.f32 %v758_v7, %v735_v50  ;;  %v2090_v7 = vadd.f32 %v351_v45, %v1831_v6 }
 0x3e0   :  { %v1512_v9 = vpop.eup %1511  ;;  %919 = vrot.lane.b32.xlu1 %v913_v1, %s1533_s26  ;;  %v728_v54 = vpop.permute.xlu1 %727 }
 0x3e1   :  { %v736_v13 = vadd.f32 %v728_v54, %v704_v8  ;;  %v760_v16 = vpop.permute.xlu0 %759  ;;  %v869_v4 = vmul.f32 %v1512_v9, %v850_v61  ;;  %vm874_vm1 = vweird.f32 %v1512_v9  ;;  %v822_v1 = vpop.permute.xlu2 %821 }
 0x3e2   :  { %vm875_vm5 = vmor %vm873_vm3, %vm874_vm1 }
 0x3e3   :  { %v768_v62 = vadd.f32 %v760_v16, %v736_v13  ;;  %v870_v43 = vsub.f32 1.0, %v869_v4 }
 0x3e5   :  { %v871_v34 = vmul.f32 %v1512_v9, %v870_v43  ;;  %v800_v47 = vadd.f32 %v792_v37, %v768_v62 }
 0x3e7   :  { %v872_v15 = vadd.f32 %v1512_v9, %v871_v34 }
 0x3e8   :  { %v824_v17 = vpop.permute.xlu1 %823 }
 0x3e9   :  { %v832_v31 = vadd.f32 %v824_v17, %v800_v47  ;;  %v790_v56 = vpop.permute.xlu0 %789  ;;  %v876_v5 = vsel %vm875_vm5, %v1512_v9, %v872_v15 }
 0x3ea   :  { %v799_v57 = vadd.f32 %v790_v56, %v767_v30  ;;  %v2084_v63 = vsel %vm878_vm6, %v880_v49, %v876_v5 }
 0x3eb   :  { %v836_v8 = vadd.f32 %v832_v31, %v2082_v52  ;;  %v914_v61 = vmul.f32 %v2084_v63, %v1691_v14 }
 0x3ec   :  { %v831_v32 = vadd.f32 %v822_v1, %v799_v57 }
 0x3ed   :  { %v1445_v54 = vmul.f32 -1.442695, %v836_v8  ;;  %921 = vrot.lane.b32.xlu0 %v914_v61, %s1533_s26 }
 0x3ee   :  { %v835_v10 = vadd.f32 %v831_v32, %v2090_v7 }
 0x3ef   :  { %1513 = vpow2.f32 %v1445_v54 }
 0x3f0   :  { %v1444_v9 = vmul.f32 -1.442695, %v835_v10 }
 0x3f2   :  { %1515 = vpow2.f32 %v1444_v9 }
 0x3f5   :  { %v1514_v37 = vpop.eup %1513 }
 0x3f6   :  { %v852_v13 = vadd.f32 1.0, %v1514_v37 }
 0x3f8   :  { %v1516_v16 = vpop.eup %1515  ;;  %1517 = vrcp.f32 %v852_v13  ;;  %v909_v45 = vand.u32 2147483648, %v852_v13  ;;  %v907_v34 = vand.u32 2147483647, %v852_v13  ;;  %vm903_vm14 = vweird.f32 %v852_v13 }
 0x3f9   :  { %v851_v4 = vadd.f32 1.0, %v1516_v16 }
 0x3fa   :  { %v910_v15 = vor.u32 1.1754944e-38, %v909_v45  ;;  %vm908_vm1 = vcmp.eq.f32.partialorder %v907_v34, 8.507059e+37  ;;  %v1077_v45 = vld [vmem:[%s2346_s12] sm:$0xff] }
 0x3fb   :  { %1519 = vrcp.f32 %v851_v4  ;;  %v894_v47 = vand.u32 2147483648, %v851_v4  ;;  %v892_v30 = vand.u32 2147483647, %v851_v4  ;;  %vm888_vm3 = vweird.f32 %v851_v4 }
 0x3fd   :  { %v895_v57 = vor.u32 1.1754944e-38, %v894_v47  ;;  %vm893_vm6 = vcmp.eq.f32.partialorder %v892_v30, 8.507059e+37 }
 0x3fe   :  { %v1518_v62 = vpop.eup %1517 }
 0x3ff   :  { %v899_v14 = vmul.f32 %v1518_v62, %v852_v13  ;;  %vm904_vm13 = vweird.f32 %v1518_v62 }
 0x400   :  { %vm905_vm15 = vmor %vm903_vm14, %vm904_vm13 }
 0x401   :  { %v1520_v43 = vpop.eup %1519  ;;  %v900_v6 = vsub.f32 1.0, %v899_v14  ;;  %v1080_v14 = vld [vmem:[%s2346_s12 + $0x18] sm:$0xff] }
 0x402   :  { %v884_v50 = vmul.f32 %v1520_v43, %v851_v4  ;;  %vm889_vm0 = vweird.f32 %v1520_v43 }
 0x403   :  { %v901_v18 = vmul.f32 %v1518_v62, %v900_v6  ;;  %vm890_vm5 = vmor %vm888_vm3, %vm889_vm0  ;;  %v1078_v6 = vld [vmem:[%s2346_s12 + $0x8] sm:$0xff] }
 0x404   :  { %v885_v51 = vsub.f32 1.0, %v884_v50 }
 0x405   :  { %v902_v46 = vadd.f32 %v1518_v62, %v901_v18 }
 0x406   :  { %v886_v17 = vmul.f32 %v1520_v43, %v885_v51 }
 0x407   :  { %v906_v49 = vsel %vm905_vm15, %v1518_v62, %v902_v46  ;;  %v1081_v62 = vld [vmem:[%s2346_s12 + $0x20] sm:$0x7f] }
 0x408   :  { %v2094_v31 = vsel %vm908_vm1, %v910_v15, %v906_v49  ;;  %v887_v56 = vadd.f32 %v1520_v43, %v886_v17 }
 0x409   :  { %v916_v5 = vmul.f32 %v1745_v36, %v2094_v31 }
 0x40a   :  { %v891_v1 = vsel %vm890_vm5, %v1520_v43, %v887_v56 }
 0x40b   :  { %1001 = vrot.lane.b32.xlu2 %v916_v5, %s1533_s26  ;;  %v2099_v8 = vsel %vm893_vm6, %v895_v57, %v891_v1 }
 0x40c   :  { %v915_v61 = vmul.f32 %v1740_v35, %v2099_v8 }
 0x40e   :  { %999 = vrot.lane.b32.xlu0 %v915_v61, %s1533_s26 }
 0x452   :  { %v920_v32 = vpop.permute.xlu1 %919 }
 0x453   :  { %v925_v36 = vsel %vm141_vm2, %v1723_v28, %v920_v32 }
 0x45f   :  { %v922_v54 = vpop.permute.xlu0 %921 }
 0x460   :  { %v926_v10 = vsel %vm141_vm2, %v1718_v27, %v922_v54 }
 0x461   :  { %941 = vmatpush.msra.mxu0 %v926_v10 }
 0x463   :  { %942 = vmatpush.msra.mxu0 %v925_v36 }
 0x464   :  { %1446 = vmatmul.msk.f32.vlgmr.msra.gmra.mxu0 %vm367_vm4, %v1760_v44 }
 0x465   :  { %v1002_v9 = vpop.permute.xlu2 %1001 }
 0x466   :  { %v2112_v37 = vsel %vm141_vm2, %v1794_v58, %v1002_v9 }
 0x467   :  { %1021 = vmatpush.msrb.mxu2 %v2112_v37 }
 0x46c   :  { %1447 = vmatmul.msk.f32.gmra.mxu0 %vm367_vm4, %v1816_v0 }
 0x480   :  { %v1000_v35 = vpop.permute.xlu0 %999 }
 0x481   :  { %v1005_v27 = vsel %vm141_vm2, %v1799_v59, %v1000_v35  ;;  %vm1374_vm2 = vcmask 64512  }
 0x482   :  { %1022 = vmatpush.msrb.mxu2 %v1005_v27 }
 0x483   :  { %1450 = vmatmul.msk.f32.vlgmr.msrb.gmra.mxu2 %vm367_vm4, %v1760_v44 }
 0x48b   :  { %1451 = vmatmul.msk.f32.gmra.mxu2 %vm367_vm4, %v1816_v0 }
 0x4e1   :  { %v944_v28 = vpop.f32.mrf.mxu0 }
 0x4e2   :  { %975 = vrot.lane.b32.xlu1 %v944_v28, %s1534_s10 }
 0x4e9   :  { %v947_v58 = vpop.f32.mrf.mxu0 }
 0x4ea   :  { %964 = vmatpush.msra.mxu1 %v947_v58  ;;  %977 = vrot.lane.b32.xlu0 %v947_v58, %s1534_s10 }
 0x4ec   :  { %965 = vmatpush.msra.mxu1 %v944_v28 }
 0x4ed   :  { %1448 = vmatmul.msk.f32.vlgmr.msra.gmra.mxu1 %vm367_vm4, %v1760_v44 }
 0x4ee   :  { %1454 = vmatpush.msk.msrb.mxu1 %vm562_vm7, %v1081_v62 }
 0x4f0   :  { %1109 = vmatpush.msrb.mxu1 %v1080_v14 }
 0x4f5   :  { %1449 = vmatmul.msk.f32.gmra.mxu1 %vm367_vm4, %v1816_v0 }
 0x506   :  { %v1024_v59 = vpop.f32.mrf.mxu2 }
 0x50e   :  { %v1027_v13 = vpop.f32.mrf.mxu2 }
 0x50f   :  { %1044 = vmatpush.msrb.mxu0 %v1027_v13 }
 0x511   :  { %1045 = vmatpush.msrb.mxu0 %v1024_v59 }
 0x512   :  { %1452 = vmatmul.msk.f32.vlgmr.msrb.gmra.mxu0 %vm367_vm4, %v1760_v44  ;;  %v1079_v44 = vld [vmem:[%s2346_s12 + $0x10] sm:$0xff]  ;;  %s1552_s12 = smov 104  }
 0x513   :  { %1110 = vmatpush.msrb.mxu1 %v1079_v44 }
 0x515   :  { %1111 = vmatpush.msrb.mxu1 %v1078_v6 }
 0x517   :  { %1112 = vmatpush.msrb.mxu1 %v1077_v45 }
 0x51a   :  { %1453 = vmatmul.msk.f32.gmra.mxu0 %vm367_vm4, %v1816_v0 }
 0x554   :  { %v976_v50 = vpop.permute.xlu1 %975 }
 0x555   :  { %v989_v18 = vsel %vm444_vm8, %v925_v36, %v976_v50 }
 0x55c   :  { %v978_v47 = vpop.permute.xlu0 %977 }
 0x55d   :  { %v990_v15 = vsel %vm444_vm8, %v926_v10, %v978_v47 }
 0x56a   :  { %v967_v16 = vpop.f32.mrf.mxu1 }
 0x56b   :  { %983 = vrot.lane.b32.xlu2 %v967_v16, %s1538_s30 }
 0x572   :  { %v970_v4 = vpop.f32.mrf.mxu1 }
 0x573   :  { %985 = vrot.lane.b32.xlu1 %v970_v4, %s1538_s30  ;;  %1055 = vrot.lane.b32.xlu2 %v1024_v59, %s1534_s10 }
 0x57b   :  { %1057 = vrot.lane.b32.xlu1 %v1027_v13, %s1534_s10  ;;  %s1553_s10 = smov 120  }
 0x583   :  { %1302 = vrot.lane.b32.xlu1 %v2065_v11, %s1547_s19 }
 0x58f   :  { %v1047_v0 = vpop.f32.mrf.mxu0 }
 0x590   :  { %1063 = vrot.lane.b32.xlu0 %v1047_v0, %s1538_s30 }
 0x597   :  { %v1050_v43 = vpop.f32.mrf.mxu0 }
 0x598   :  { %1065 = vrot.lane.b32.xlu2 %v1050_v43, %s1538_s30 }
 0x5c5   :  { %v984_v11 = vpop.permute.xlu2 %983 }
 0x5c6   :  { %v991_v34 = vsel %vm447_vm9, %v989_v18, %v984_v11 }
 0x5c7   :  { %v993_v51 = vsel %vm450_vm10, %v991_v34, %v1898_v48 }
 0x5c8   :  { %v995_v46 = vsel %vm453_vm11, %v993_v51, 1.0 }
 0x5c9   :  { %1455 = vmatmul.msk.f32.vlgmr.msrb.gmra.mxu1 %vm549_vm12, %v995_v46 }
 0x5cd   :  { %v1056_v5 = vpop.permute.xlu2 %1055 }
 0x5ce   :  { %v1069_v48 = vsel %vm444_vm8, %v1005_v27, %v1056_v5 }
 0x5e5   :  { %v986_v17 = vpop.permute.xlu1 %985 }
 0x5e6   :  { %v992_v30 = vsel %vm447_vm9, %v990_v15, %v986_v17  ;;  %v1532_v17 = vld [vmem:[%s2335_s1 + $0x18] sm:$0xff] }
 0x5e7   :  { %v994_v49 = vsel %vm450_vm10, %v992_v30, %v1907_v55 }
 0x5e8   :  { %v996_v56 = vsel %vm453_vm11, %v994_v49, 1.0 }
 0x5e9   :  { %1456 = vmatmul.msk.f32.gmra.mxu1 %vm549_vm12, %v996_v56 }
 0x5ed   :  { %v1058_v1 = vpop.permute.xlu1 %1057 }
 0x5ee   :  { %v1070_v55 = vsel %vm444_vm8, %v2112_v37, %v1058_v1 }
 0x5f2   :  { %v1066_v32 = vpop.permute.xlu2 %1065 }
 0x5f3   :  { %v1072_v36 = vsel %vm447_vm9, %v1070_v55, %v1066_v32 }
 0x5f4   :  { %v1074_v9 = vsel %vm450_vm10, %v1072_v36, %v1927_v12 }
 0x5f5   :  { %v1076_v35 = vsel %vm453_vm11, %v1074_v9, 1.0 }
 0x602   :  { %v1064_v57 = vpop.permute.xlu0 %1063 }
 0x603   :  { %v1071_v61 = vsel %vm447_vm9, %v1069_v48, %v1064_v57 }
 0x604   :  { %v1073_v54 = vsel %vm450_vm10, %v1071_v61, %v1917_v3 }
 0x605   :  { %v1075_v10 = vsel %vm453_vm11, %v1073_v54, 1.0 }
 0x606   :  { %1457 = vmatmul.msk.f32.gmra.mxu1 %vm549_vm12, %v1075_v10 }
 0x60e   :  { %1458 = vmatmul.msk.f32.gmra.mxu1 %vm549_vm12, %v1076_v35 }
 0x646   :  { %v2182_v27 = vpop.f32.mrf.mxu1 }
 0x647   :  { %v1178_v3 = vmul.f32 %v2182_v27, %v1944_v23  ;;  %v1154_v28 = vmul.f32 %v2182_v27, %v1940_v21  ;;  %v1130_v37 = vmul.f32 %v2182_v27, %v1938_v20  ;;  %v1250_v12 = vmul.f32 %v2182_v27, %v1967_v38 }
 0x648   :  { %v1226_v58 = vmul.f32 %v2182_v27, %v1950_v25  ;;  %v1202_v59 = vmul.f32 %v2182_v27, %v1969_v39  ;;  %v1274_v13 = vmul.f32 %v2182_v27, %v1971_v40 }
 0x649   :  { %1186 = vrot.lane.b32.xlu2 %v1178_v3, %s1552_s12  ;;  %1162 = vrot.lane.b32.xlu1 %v1154_v28, %s1547_s19 }
 0x64a   :  { %1138 = vrot.lane.b32.xlu0 %v1130_v37, %s1553_s10 }
 0x651   :  { %1258 = vrot.lane.b32.xlu2 %v1250_v12, %s1545_s11  ;;  %1234 = vrot.lane.b32.xlu1 %v1226_v58, %s1554_s28 }
 0x652   :  { %1210 = vrot.lane.b32.xlu0 %v1202_v59, %s1546_s18 }
 0x65a   :  { %1282 = vrot.lane.b32.xlu0 %v1274_v13, %s1555_s2 }
 0x666   :  { %v2205_v16 = vpop.f32.mrf.mxu1 }
 0x667   :  { %v1179_v4 = vmul.f32 %v2205_v16, %v1942_v22  ;;  %v1155_v62 = vmul.f32 %v2205_v16, %v1952_v26  ;;  %v1131_v14 = vmul.f32 %v2205_v16, %v1936_v19  ;;  %v1251_v44 = vmul.f32 %v2205_v16, %v1954_v29 }
 0x668   :  { %v1227_v0 = vmul.f32 %v2205_v16, %v1948_v24  ;;  %v1203_v43 = vmul.f32 %v2205_v16, %v1946_v60  ;;  %v1275_v6 = vmul.f32 %v2205_v16, %v2002_v53  ;;  %v1127_v59 = vmul.f32 %v2205_v16, %v2056_v33 }
 0x669   :  { %1188 = vrot.lane.b32.xlu0 %v1179_v4, %s1552_s12  ;;  %1164 = vrot.lane.b32.xlu2 %v1155_v62, %s1547_s19 }
 0x66a   :  { %1140 = vrot.lane.b32.xlu1 %v1131_v14, %s1553_s10 }
 0x671   :  { %1260 = vrot.lane.b32.xlu0 %v1251_v44, %s1545_s11  ;;  %1236 = vrot.lane.b32.xlu2 %v1227_v0, %s1554_s28 }
 0x672   :  { %1212 = vrot.lane.b32.xlu1 %v1203_v43, %s1546_s18 }
 0x67a   :  { %1284 = vrot.lane.b32.xlu1 %v1275_v6, %s1555_s2 }
 0x683   :  { %v2228_v45 = vpop.f32.mrf.mxu1 }
 0x684   :  { %v1180_v50 = vmul.f32 %v2228_v45, %v1944_v23  ;;  %v1156_v18 = vmul.f32 %v2228_v45, %v1940_v21  ;;  %v1132_v11 = vmul.f32 %v2228_v45, %v1938_v20  ;;  %v1252_v34 = vmul.f32 %v2228_v45, %v1967_v38 }
 0x685   :  { %v1228_v51 = vmul.f32 %v2228_v45, %v1950_v25  ;;  %v1204_v23 = vmul.f32 %v2228_v45, %v1969_v39  ;;  %v1276_v25 = vmul.f32 %v2228_v45, %v1971_v40  ;;  %v1128_v16 = vmul.f32 %v2228_v45, %v2058_v41 }
 0x686   :  { %1190 = vrot.lane.b32.xlu1 %v1180_v50, %s1552_s12  ;;  %1166 = vrot.lane.b32.xlu0 %v1156_v18, %s1547_s19 }
 0x687   :  { %1142 = vrot.lane.b32.xlu2 %v1132_v11, %s1553_s10 }
 0x68b   :  { %v2248_v20 = vpop.f32.mrf.mxu1 }
 0x68c   :  { %v1157_v21 = vmul.f32 %v2248_v20, %v1952_v26  ;;  %v1133_v38 = vmul.f32 %v2248_v20, %v1936_v19  ;;  %v1229_v39 = vmul.f32 %v2248_v20, %v1948_v24  ;;  %v1205_v46 = vmul.f32 %v2248_v20, %v1946_v60  ;;  %v1303_v60 = vpop.permute.xlu1 %1302  ;;  %v1530_v24 = vld [vmem:[%s2335_s1 + $0x8] sm:$0xff] }
 0x68d   :  { %v1181_v26 = vmul.f32 %v2248_v20, %v1942_v22  ;;  %v1277_v19 = vmul.f32 %v2248_v20, %v2002_v53  ;;  %v1253_v40 = vmul.f32 %v2248_v20, %v1954_v29  ;;  %v1529_v22 = vld [vmem:[%s2335_s1 + $0x10] sm:$0xff]  ;;  %v1531_v29 = vld [vmem:[%s2335_s1] sm:$0xff]  ;;  %v1126_v53 = vmul.f32 %v2182_v27, %v2058_v41 }
 0x68e   :  { %1262 = vrot.lane.b32.xlu1 %v1252_v34, %s1545_s11  ;;  %1238 = vrot.lane.b32.xlu0 %v1228_v51, %s1554_s28  ;;  %v1129_v51 = vmul.f32 %v2248_v20, %v2056_v33 }
 0x68f   :  { %1214 = vrot.lane.b32.xlu2 %v1204_v23, %s1546_s18 }
 0x696   :  { %1168 = vrot.lane.b32.xlu1 %v1157_v21, %s1547_s19  ;;  %1144 = vrot.lane.b32.xlu0 %v1133_v38, %s1553_s10 }
 0x697   :  { %1286 = vrot.lane.b32.xlu2 %v1276_v25, %s1555_s2 }
 0x69e   :  { %1240 = vrot.lane.b32.xlu1 %v1229_v39, %s1554_s28  ;;  %1216 = vrot.lane.b32.xlu0 %v1205_v46, %s1546_s18 }
 0x69f   :  { %1192 = vrot.lane.b32.xlu2 %v1181_v26, %s1552_s12 }
 0x6a3   :  { %v1187_v47 = vpop.permute.xlu2 %1186 }
 0x6a6   :  { %1308 = vrot.lane.b32.xlu1 %v2082_v52, %s1547_s19  ;;  %1288 = vrot.lane.b32.xlu0 %v1277_v19, %s1555_s2 }
 0x6a7   :  { %1264 = vrot.lane.b32.xlu2 %v1253_v40, %s1545_s11 }
 0x6ab   :  { %v1259_v48 = vpop.permute.xlu2 %1258 }
 0x6ae   :  { %1326 = vrot.lane.b32.xlu1 %v1529_v22, %s1556_s0  ;;  %1306 = vrot.lane.b32.xlu0 %v2090_v7, %s1547_s19 }
 0x6af   :  { %1304 = vrot.lane.b32.xlu2 %v2069_v2, %s1547_s19 }
 0x6b6   :  { %1324 = vrot.lane.b32.xlu0 %v1530_v24, %s1556_s0 }
 0x6b7   :  { %1322 = vrot.lane.b32.xlu2 %v1531_v29, %s1556_s0 }
 0x6bb   :  { %v1163_v52 = vpop.permute.xlu1 %1162 }
 0x6bc   :  { %v1139_v7 = vpop.permute.xlu0 %1138 }
 0x6bd   :  { %v1150_v2 = vadd.f32 %v1139_v7, %v1126_v53 }
 0x6bf   :  { %v1174_v15 = vadd.f32 %v1163_v52, %v1150_v2  ;;  %1328 = vrot.lane.b32.xlu2 %v1532_v17, %s1556_s0 }
 0x6c1   :  { %v1198_v30 = vadd.f32 %v1187_v47, %v1174_v15 }
 0x6c3   :  { %v1235_v5 = vpop.permute.xlu1 %1234  ;;  %v1165_v54 = vpop.permute.xlu2 %1164 }
 0x6c4   :  { %v1211_v49 = vpop.permute.xlu0 %1210 }
 0x6c5   :  { %v1222_v56 = vadd.f32 %v1211_v49, %v1198_v30 }
 0x6c7   :  { %v1246_v57 = vadd.f32 %v1235_v5, %v1222_v56 }
 0x6c9   :  { %v1270_v1 = vadd.f32 %v1259_v48, %v1246_v57 }
 0x6cb   :  { %v1237_v36 = vpop.permute.xlu2 %1236 }
 0x6cc   :  { %v1283_v61 = vpop.permute.xlu0 %1282 }
 0x6cd   :  { %v1294_v32 = vadd.f32 %v1283_v61, %v1270_v1  ;;  %v1338_v61 = vsub.f32 1.0, %v2076_v42 }
 0x6cf   :  { %v1314_v10 = vadd.f32 %v1303_v60, %v1294_v32 }
 0x6d1   :  { %1521 = vtanh.f32 %v1314_v10 }
 0x6d7   :  { %v1522_v55 = vpop.eup %1521 }
 0x6d8   :  { %1346 = vrot.lane.b32.xlu0 %v1522_v55, %s1556_s0 }
 0x6db   :  { %v1189_v27 = vpop.permute.xlu0 %1188 }
 0x6dc   :  { %v1141_v9 = vpop.permute.xlu1 %1140 }
 0x6dd   :  { %v1151_v13 = vadd.f32 %v1141_v9, %v1127_v59 }
 0x6df   :  { %v1175_v4 = vadd.f32 %v1165_v54, %v1151_v13 }
 0x6e1   :  { %v1143_v35 = vpop.permute.xlu2 %1142  ;;  %v1199_v0 = vadd.f32 %v1189_v27, %v1175_v4  ;;  %v1339_v27 = vsub.f32 1.0, %v2084_v63  ;;  %v1341_v4 = vsub.f32 1.0, %v2094_v31 }
 0x6e2   :  { %v1152_v26 = vadd.f32 %v1143_v35, %v1128_v16  ;;  %v1340_v35 = vsub.f32 1.0, %v2099_v8 }
 0x6e3   :  { %v1261_v37 = vpop.permute.xlu0 %1260 }
 0x6e4   :  { %v1213_v3 = vpop.permute.xlu1 %1212 }
 0x6e5   :  { %v1223_v43 = vadd.f32 %v1213_v3, %v1199_v0 }
 0x6e7   :  { %v1247_v11 = vadd.f32 %v1237_v36, %v1223_v43 }
 0x6e9   :  { %v1215_v28 = vpop.permute.xlu2 %1214  ;;  %v1271_v34 = vadd.f32 %v1261_v37, %v1247_v11 }
 0x6ec   :  { %v1285_v12 = vpop.permute.xlu1 %1284 }
 0x6ed   :  { %v1295_v23 = vadd.f32 %v1285_v12, %v1271_v34 }
 0x6f1   :  { %v1287_v58 = vpop.permute.xlu2 %1286 }
 0x6f8   :  { %v1191_v62 = vpop.permute.xlu1 %1190  ;;  %v1167_v14 = vpop.permute.xlu0 %1166 }
 0x6f9   :  { %v1193_v44 = vpop.permute.xlu2 %1192  ;;  %v1176_v40 = vadd.f32 %v1167_v14, %v1152_v26 }
 0x6fb   :  { %v1200_v29 = vadd.f32 %v1191_v62, %v1176_v40 }
 0x6fd   :  { %v1224_v20 = vadd.f32 %v1215_v28, %v1200_v29 }
 0x700   :  { %v1263_v6 = vpop.permute.xlu1 %1262  ;;  %v1239_v50 = vpop.permute.xlu0 %1238 }
 0x701   :  { %v1265_v18 = vpop.permute.xlu2 %1264  ;;  %v1248_v7 = vadd.f32 %v1239_v50, %v1224_v20 }
 0x703   :  { %v1272_v15 = vadd.f32 %v1263_v6, %v1248_v7 }
 0x705   :  { %v1296_v30 = vadd.f32 %v1287_v58, %v1272_v15 }
 0x708   :  { %v1169_v21 = vpop.permute.xlu1 %1168  ;;  %v1145_v38 = vpop.permute.xlu0 %1144 }
 0x709   :  { %v1153_v25 = vadd.f32 %v1145_v38, %v1129_v51  ;;  %v1305_v39 = vpop.permute.xlu2 %1304 }
 0x70a   :  { %v1315_v46 = vadd.f32 %v1305_v39, %v1295_v23 }
 0x70b   :  { %v1177_v19 = vadd.f32 %v1169_v21, %v1153_v25 }
 0x70c   :  { %1523 = vtanh.f32 %v1315_v46 }
 0x70d   :  { %v1201_v22 = vadd.f32 %v1193_v44, %v1177_v19 }
 0x710   :  { %v1241_v60 = vpop.permute.xlu1 %1240  ;;  %v1217_v24 = vpop.permute.xlu0 %1216 }
 0x711   :  { %v1225_v53 = vadd.f32 %v1217_v24, %v1201_v22  ;;  %v1323_v1 = vpop.permute.xlu2 %1322 }
 0x712   :  { %v1524_v52 = vpop.eup %1523  ;;  %v1334_v54 = vmul.f32 %v1323_v1, %v2076_v42 }
 0x713   :  { %v1249_v33 = vadd.f32 %v1241_v60, %v1225_v53  ;;  %1348 = vrot.lane.b32.xlu1 %v1524_v52, %s1556_s0 }
 0x715   :  { %v1273_v47 = vadd.f32 %v1265_v18, %v1249_v33 }
 0x718   :  { %v1289_v41 = vpop.permute.xlu0 %1288  ;;  %v1309_v2 = vpop.permute.xlu1 %1308 }
 0x719   :  { %v1297_v45 = vadd.f32 %v1289_v41, %v1273_v47  ;;  %v1329_v36 = vpop.permute.xlu2 %1328 }
 0x71a   :  { %v1337_v14 = vmul.f32 %v1329_v36, %v2094_v31 }
 0x71b   :  { %v1317_v17 = vadd.f32 %v1309_v2, %v1297_v45 }
 0x71d   :  { %1525 = vtanh.f32 %v1317_v17 }
 0x720   :  { %v1307_v49 = vpop.permute.xlu0 %1306  ;;  %v1327_v9 = vpop.permute.xlu1 %1326 }
 0x721   :  { %v1316_v56 = vadd.f32 %v1307_v49, %v1296_v30  ;;  %v1336_v28 = vmul.f32 %v1327_v9, %v2099_v8 }
 0x723   :  { %v1526_v5 = vpop.eup %1525  ;;  %1527 = vtanh.f32 %v1316_v56 }
 0x724   :  { %1352 = vrot.lane.b32.xlu0 %v1526_v5, %s1556_s0 }
 0x728   :  { %v1325_v57 = vpop.permute.xlu0 %1324 }
 0x729   :  { %v1528_v48 = vpop.eup %1527  ;;  %v1335_v58 = vmul.f32 %v1325_v57, %v2084_v63 }
 0x72a   :  { %1350 = vrot.lane.b32.xlu2 %v1528_v48, %s1556_s0 }
 0x74a   :  { %v1347_v32 = vpop.permute.xlu0 %1346 }
 0x74b   :  { %v1358_v10 = vmul.f32 %v1347_v32, %v1338_v61 }
 0x74d   :  { %v1362_v55 = vadd.f32 %v1358_v10, %v1334_v54 }
 0x74f   :  { %1368 = vrot.lane.b32.xlu1 %v1362_v55, %s1553_s10 }
 0x784   :  { %v1351_v3 = vpop.permute.xlu2 %1350 }
 0x785   :  { %v1349_v37 = vpop.permute.xlu1 %1348  ;;  %v1360_v12 = vmul.f32 %v1351_v3, %v1340_v35 }
 0x786   :  { %v1359_v59 = vmul.f32 %v1349_v37, %v1339_v27 }
 0x787   :  { %v1364_v13 = vadd.f32 %v1360_v12, %v1336_v28 }
 0x788   :  { %v1363_v42 = vadd.f32 %v1359_v59, %v1335_v58 }
 0x789   :  { %1379 = vrot.lane.b32.xlu0 %v1364_v13, %s1553_s10 }
 0x78a   :  { %1370 = vrot.lane.b32.xlu2 %v1363_v42, %s1553_s10 }
 0x796   :  { %v1353_v62 = vpop.permute.xlu0 %1352 }
 0x797   :  { %v1361_v44 = vmul.f32 %v1353_v62, %v1341_v4 }
 0x799   :  { %v1365_v0 = vadd.f32 %v1361_v44, %v1337_v14 }
 0x79b   :  { %1381 = vrot.lane.b32.xlu1 %v1365_v0, %s1553_s10 }
 0x7c1   :  { %v1369_v8 = vpop.permute.xlu1 %1368 }
 0x7c2   :  { %1375 = vst.msk [vmem:[%s2347_s15] sm:$0xff] %vm1374_vm2, %v1369_v8 }
 0x7e4   :  { %v1371_v63 = vpop.permute.xlu2 %1370 }
 0x7e5   :  { %1376 = vst.msk [vmem:[%s2347_s15 + $0x8] sm:$0xff] %vm1374_vm2, %v1371_v63 }
 0x7fb   :  { %v1380_v43 = vpop.permute.xlu0 %1379 }
 0x7fc   :  { %1459 = vst.msk [vmem:[%s2347_s15 + $0x10] sm:$0xff] %vm1374_vm2, %v1380_v43 }
 0x80d   :  { %v1382_v31 = vpop.permute.xlu1 %1381 }
 0x80e   :  { %1460 = vst.msk [vmem:[%s2347_s15 + $0x18] sm:$0xff] %vm1374_vm2, %v1382_v31 }

</bundles_post_ra>
